<compile_context>
chip_gen: v6e
topology: v6e:2x2x1
jax: 0.10.0
libtpu: 0.0.40
codegen_flags: <defaults>
</compile_context>

<pallas_src>
import functools

import jax
import jax.numpy as jnp
import numpy as np
from jax.experimental import pallas as pl
from jax.experimental.pallas import tpu as pltpu

BN_EPS = 1e-5
PAD = 128                                       # lane-dense padded width
HIDDEN_DIMS = [128, 128, 128, 128, 8, 128, 128, 128, 128]
N_BLOCKS = len(HIDDEN_DIMS)                     # 9 Linear+BN+ReLU blocks
N_LAYERS = N_BLOCKS + 1                         # + final Linear
VROWS = 16                                      # sublane-aligned rows of v_slab


def autoencoder_kernel(x_ref, w_ref, v_ref, out_ref, *, d_in, d_out):
    # x_ref: (B, d_in) f32 | w_ref: (10, 128, 128) bf16 | v_ref: (2, 16, 128) f32
    x = x_ref[...]                                              # (B, d_in)
    for l in range(N_BLOCKS):
        if l == 0:
            # static, sublane-aligned ref slice: only the live d_in rows loaded
            wt = w_ref[0, 0:d_in, :].astype(jnp.float32)        # (d_in, 128)
        else:
            wt = w_ref[l].astype(jnp.float32)                   # (128, 128)
        gamma = v_ref[0, l:l + 1, :]                            # (1, 128)
        beta = v_ref[1, l:l + 1, :]                             # (1, 128)
        # Linear (bias dropped: cancels exactly through BN's mean subtraction)
        y = jnp.dot(x, wt, preferred_element_type=jnp.float32)  # (B, 128)
        # One-pass batch statistics (biased variance, clamped at 0)
        mean = jnp.mean(y, axis=0, keepdims=True)               # (1, 128)
        mean_sq = jnp.mean(y * y, axis=0, keepdims=True)
        var = jnp.maximum(mean_sq - mean * mean, 0.0)
        # BN folded into one FMA over the (B, 128) activation, then ReLU.
        # Padded lanes: y == 0, gamma == 0 -> scale/shift == 0 -> stay 0.
        scale = gamma * jax.lax.rsqrt(var + BN_EPS)             # (1, 128)
        shift = beta - mean * scale
        x = jnp.maximum(y * scale + shift, 0.0)
    # Final Linear (keeps its bias); write only the live d_out lanes.
    wt = w_ref[N_BLOCKS].astype(jnp.float32)                    # (128, 128)
    bias = v_ref[1, N_BLOCKS:N_BLOCKS + 1, :]                   # (1, 128)
    y = jnp.dot(x, wt, preferred_element_type=jnp.float32) + bias
    out_ref[...] = y[:, :d_out]


def init_params(key, input_dims):
    """Packed parameter slabs mirroring the PyTorch module's default init.

    Returns (w_slab bf16 (10,128,128), v_slab f32 (2,16,128), dense_biases).
    dense_biases are only used by the pure-JAX reference to show that dropping
    them in the kernel is exact (they cancel through BatchNorm).
    """
    dims = [input_dims] + HIDDEN_DIMS
    w_slab = np.zeros((N_LAYERS, PAD, PAD), np.float32)
    v_slab = np.zeros((2, VROWS, PAD), np.float32)   # plane 0: gamma, 1: beta/bias
    dense_biases = []
    keys = jax.random.split(key, 2 * N_LAYERS)
    k = 0
    for li in range(N_BLOCKS):
        fan_in, fan_out = dims[li], dims[li + 1]
        bound = 1.0 / np.sqrt(fan_in)
        w = jax.random.uniform(keys[k], (fan_out, fan_in), jnp.float32, -bound, bound)
        b = jax.random.uniform(keys[k + 1], (fan_out,), jnp.float32, -bound, bound)
        k += 2
        w_slab[li, :fan_in, :fan_out] = np.asarray(w).T          # pre-transposed
        v_slab[0, li, :fan_out] = 1.0                            # gamma
        v_slab[1, li, :fan_out] = 0.0                            # beta
        dense_biases.append(b)                                   # reference only
    # final Linear: 128 -> input_dims
    bound = 1.0 / np.sqrt(128)
    w = jax.random.uniform(keys[k], (input_dims, 128), jnp.float32, -bound, bound)
    b = jax.random.uniform(keys[k + 1], (input_dims,), jnp.float32, -bound, bound)
    w_slab[N_BLOCKS, :128, :input_dims] = np.asarray(w).T
    v_slab[1, N_BLOCKS, :input_dims] = np.asarray(b)
    return (jnp.asarray(w_slab, jnp.bfloat16),
            jnp.asarray(v_slab, jnp.float32),
            dense_biases)


@functools.partial(jax.jit, static_argnames=("input_dims",))
def autoencoder_forward(x, w_slab, v_slab, *, input_dims):
    batch = x.shape[0]
    d_in = ((input_dims + 7) // 8) * 8          # sublane-aligned contraction width
    x = x.astype(jnp.float32)
    if d_in != input_dims:
        x = jnp.pad(x, ((0, 0), (0, d_in - input_dims)))
    kernel = functools.partial(autoencoder_kernel, d_in=d_in, d_out=input_dims)
    out = pl.pallas_call(
        kernel,
        out_shape=jax.ShapeDtypeStruct((batch, input_dims), jnp.float32),
        grid=(1,),
        in_specs=[
            pl.BlockSpec((batch, d_in), lambda i: (0, 0)),
            pl.BlockSpec((N_LAYERS, PAD, PAD), lambda i: (0, 0, 0)),
            pl.BlockSpec((2, VROWS, PAD), lambda i: (0, 0, 0)),
        ],
        out_specs=pl.BlockSpec((batch, input_dims), lambda i: (0, 0)),
        compiler_params=pltpu.CompilerParams(
            dimension_semantics=("arbitrary",)),
    )(x, w_slab, v_slab)
    # TODO(synk): for large independent batches, add a leading 'parallel' grid
    # axis over batch groups (each group computes its own BN statistics) to use
    # the second TensorCore on v7x; at B=16 single-core execution is optimal.
    return out


def reference_forward(x, w_slab, v_slab, dense_biases, input_dims):
    """Pure-JAX reference using the textbook formulation (two-pass variance,
    un-fused BN, NetBlock Linear biases included) on the un-padded shapes —
    verifies the kernel's algebraic rewrites are exact."""
    dims = [input_dims] + HIDDEN_DIMS
    w = w_slab.astype(jnp.float32)
    v = v_slab.astype(jnp.float32)
    h = x.astype(jnp.float32)
    for li in range(N_BLOCKS):
        fi, fo = dims[li], dims[li + 1]
        y = h @ w[li, :fi, :fo] + dense_biases[li]
        mean = jnp.mean(y, axis=0, keepdims=True)
        var = jnp.mean((y - mean) ** 2, axis=0, keepdims=True)
        gamma = v[0, li, :fo]
        beta = v[1, li, :fo]
        h = jnp.maximum((y - mean) / jnp.sqrt(var + BN_EPS) * gamma + beta, 0.0)
    return h @ w[N_BLOCKS, :128, :input_dims] + v[1, N_BLOCKS, :input_dims]


if __name__ == "__main__":
    INPUT_DIMS = 64   # e.g. mel-spectrogram feature vector length
    BATCH = 16

    key = jax.random.PRNGKey(0)
    kx, kp = jax.random.split(key)
    x = jax.random.normal(kx, (BATCH, INPUT_DIMS), jnp.float32)
    w_slab, v_slab, dense_biases = init_params(kp, INPUT_DIMS)

    out = autoencoder_forward(x, w_slab, v_slab, input_dims=INPUT_DIMS)
    out = jax.block_until_ready(out)

    ref = reference_forward(x, w_slab, v_slab, dense_biases, INPUT_DIMS)
    np.testing.assert_allclose(np.asarray(out), np.asarray(ref), rtol=1e-4, atol=1e-4)

    print("KERNEL_OK")
</pallas_src>

<mosaic_0001>
module attributes {stable_mosaic.version = 11 : i64} {
  func.func @autoencoder_kernel(%arg0: i32, %arg1: memref<16x64xf32, #tpu.memory_space<vmem>>, %arg2: memref<10x128x128xbf16, #tpu.memory_space<vmem>>, %arg3: memref<2x16x128xf32, #tpu.memory_space<vmem>>, %arg4: memref<16x64xf32, #tpu.memory_space<vmem>>) attributes {dimension_semantics = [#tpu.dimension_semantics<arbitrary>], iteration_bounds = array<i64: 1>, scalar_prefetch = 0 : i64, scratch_operands = 0 : i64, tpu.core_type = #tpu.core_type<tc>, window_params = [{pipeline_mode = #tpu.pipeline_mode<synchronous>, transform_indices = @transform_0, window_bounds = array<i64: 16, 64>}, {pipeline_mode = #tpu.pipeline_mode<synchronous>, transform_indices = @transform_1, window_bounds = array<i64: 10, 128, 128>}, {pipeline_mode = #tpu.pipeline_mode<synchronous>, transform_indices = @transform_2, window_bounds = array<i64: 2, 16, 128>}, {pipeline_mode = #tpu.pipeline_mode<synchronous>, transform_indices = @transform_3, window_bounds = array<i64: 16, 64>}]} {
    %c0 = arith.constant 0 : index
    %c0_0 = arith.constant 0 : index
    %0 = vector.load %arg1[%c0, %c0_0] : memref<16x64xf32, #tpu.memory_space<vmem>>, vector<16x64xf32>
    %c0_1 = arith.constant 0 : index
    %c0_2 = arith.constant 0 : index
    %c0_3 = arith.constant 0 : index
    %1 = vector.load %arg2[%c0_1, %c0_2, %c0_3] : memref<10x128x128xbf16, #tpu.memory_space<vmem>>, vector<1x64x128xbf16>
    %2 = vector.shape_cast %1 : vector<1x64x128xbf16> to vector<64x128xbf16>
    %3 = arith.extf %2 : vector<64x128xbf16> to vector<64x128xf32>
    %c0_4 = arith.constant 0 : index
    %c0_5 = arith.constant 0 : index
    %c0_6 = arith.constant 0 : index
    %4 = vector.load %arg3[%c0_4, %c0_5, %c0_6] : memref<2x16x128xf32, #tpu.memory_space<vmem>>, vector<1x1x128xf32>
    %5 = vector.shape_cast %4 : vector<1x1x128xf32> to vector<1x128xf32>
    %c1 = arith.constant 1 : index
    %c0_7 = arith.constant 0 : index
    %c0_8 = arith.constant 0 : index
    %6 = vector.load %arg3[%c1, %c0_7, %c0_8] : memref<2x16x128xf32, #tpu.memory_space<vmem>>, vector<1x1x128xf32>
    %7 = vector.shape_cast %6 : vector<1x1x128xf32> to vector<1x128xf32>
    %cst = arith.constant dense<0.000000e+00> : vector<16x128xf32>
    %8 = tpu.matmul %0, %3, %cst {dimension_numbers = #tpu.dot_dimension_numbers<[1], [0], [0], [1], [0, 0, 1, 1], [], []>} : vector<16x64xf32>, vector<64x128xf32>, vector<16x128xf32> -> vector<16x128xf32>
    %cst_9 = arith.constant dense<0.000000e+00> : vector<128xf32>
    %9 = vector.multi_reduction <add>, %8, %cst_9 [0] : vector<16x128xf32> to vector<128xf32>
    %10 = vector.shape_cast %9 : vector<128xf32> to vector<1x128xf32>
    %cst_10 = arith.constant 1.600000e+01 : f32
    %11 = vector.broadcast %cst_10 : f32 to vector<1x128xf32>
    %12 = arith.divf %10, %11 : vector<1x128xf32>
    %13 = arith.mulf %8, %8 : vector<16x128xf32>
    %cst_11 = arith.constant dense<0.000000e+00> : vector<128xf32>
    %14 = vector.multi_reduction <add>, %13, %cst_11 [0] : vector<16x128xf32> to vector<128xf32>
    %15 = vector.shape_cast %14 : vector<128xf32> to vector<1x128xf32>
    %cst_12 = arith.constant 1.600000e+01 : f32
    %16 = vector.broadcast %cst_12 : f32 to vector<1x128xf32>
    %17 = arith.divf %15, %16 : vector<1x128xf32>
    %18 = arith.mulf %12, %12 : vector<1x128xf32>
    %19 = arith.subf %17, %18 : vector<1x128xf32>
    %cst_13 = arith.constant 0.000000e+00 : f32
    %20 = vector.broadcast %cst_13 : f32 to vector<1x128xf32>
    %21 = arith.maximumf %19, %20 : vector<1x128xf32>
    %cst_14 = arith.constant 9.99999974E-6 : f32
    %22 = vector.broadcast %cst_14 : f32 to vector<1x128xf32>
    %23 = arith.addf %21, %22 : vector<1x128xf32>
    %24 = math.rsqrt %23 : vector<1x128xf32>
    %25 = arith.mulf %5, %24 : vector<1x128xf32>
    %26 = arith.mulf %12, %25 : vector<1x128xf32>
    %27 = arith.subf %7, %26 : vector<1x128xf32>
    %28 = vector.broadcast %25 : vector<1x128xf32> to vector<16x128xf32>
    %29 = arith.mulf %8, %28 : vector<16x128xf32>
    %30 = vector.broadcast %27 : vector<1x128xf32> to vector<16x128xf32>
    %31 = arith.addf %29, %30 : vector<16x128xf32>
    %cst_15 = arith.constant 0.000000e+00 : f32
    %32 = vector.broadcast %cst_15 : f32 to vector<16x128xf32>
    %33 = arith.maximumf %31, %32 : vector<16x128xf32>
    %c1_16 = arith.constant 1 : index
    %c0_17 = arith.constant 0 : index
    %c0_18 = arith.constant 0 : index
    %34 = vector.load %arg2[%c1_16, %c0_17, %c0_18] : memref<10x128x128xbf16, #tpu.memory_space<vmem>>, vector<1x128x128xbf16>
    %35 = vector.shape_cast %34 : vector<1x128x128xbf16> to vector<128x128xbf16>
    %36 = arith.extf %35 : vector<128x128xbf16> to vector<128x128xf32>
    %c0_19 = arith.constant 0 : index
    %c1_20 = arith.constant 1 : index
    %c0_21 = arith.constant 0 : index
    %37 = vector.load %arg3[%c0_19, %c1_20, %c0_21] : memref<2x16x128xf32, #tpu.memory_space<vmem>>, vector<1x1x128xf32>
    %38 = vector.shape_cast %37 : vector<1x1x128xf32> to vector<1x128xf32>
    %c1_22 = arith.constant 1 : index
    %c1_23 = arith.constant 1 : index
    %c0_24 = arith.constant 0 : index
    %39 = vector.load %arg3[%c1_22, %c1_23, %c0_24] : memref<2x16x128xf32, #tpu.memory_space<vmem>>, vector<1x1x128xf32>
    %40 = vector.shape_cast %39 : vector<1x1x128xf32> to vector<1x128xf32>
    %cst_25 = arith.constant dense<0.000000e+00> : vector<16x128xf32>
    %41 = tpu.matmul %33, %36, %cst_25 {dimension_numbers = #tpu.dot_dimension_numbers<[1], [0], [0], [1], [0, 0, 1, 1], [], []>} : vector<16x128xf32>, vector<128x128xf32>, vector<16x128xf32> -> vector<16x128xf32>
    %cst_26 = arith.constant dense<0.000000e+00> : vector<128xf32>
    %42 = vector.multi_reduction <add>, %41, %cst_26 [0] : vector<16x128xf32> to vector<128xf32>
    %43 = vector.shape_cast %42 : vector<128xf32> to vector<1x128xf32>
    %cst_27 = arith.constant 1.600000e+01 : f32
    %44 = vector.broadcast %cst_27 : f32 to vector<1x128xf32>
    %45 = arith.divf %43, %44 : vector<1x128xf32>
    %46 = arith.mulf %41, %41 : vector<16x128xf32>
    %cst_28 = arith.constant dense<0.000000e+00> : vector<128xf32>
    %47 = vector.multi_reduction <add>, %46, %cst_28 [0] : vector<16x128xf32> to vector<128xf32>
    %48 = vector.shape_cast %47 : vector<128xf32> to vector<1x128xf32>
    %cst_29 = arith.constant 1.600000e+01 : f32
    %49 = vector.broadcast %cst_29 : f32 to vector<1x128xf32>
    %50 = arith.divf %48, %49 : vector<1x128xf32>
    %51 = arith.mulf %45, %45 : vector<1x128xf32>
    %52 = arith.subf %50, %51 : vector<1x128xf32>
    %cst_30 = arith.constant 0.000000e+00 : f32
    %53 = vector.broadcast %cst_30 : f32 to vector<1x128xf32>
    %54 = arith.maximumf %52, %53 : vector<1x128xf32>
    %cst_31 = arith.constant 9.99999974E-6 : f32
    %55 = vector.broadcast %cst_31 : f32 to vector<1x128xf32>
    %56 = arith.addf %54, %55 : vector<1x128xf32>
    %57 = math.rsqrt %56 : vector<1x128xf32>
    %58 = arith.mulf %38, %57 : vector<1x128xf32>
    %59 = arith.mulf %45, %58 : vector<1x128xf32>
    %60 = arith.subf %40, %59 : vector<1x128xf32>
    %61 = vector.broadcast %58 : vector<1x128xf32> to vector<16x128xf32>
    %62 = arith.mulf %41, %61 : vector<16x128xf32>
    %63 = vector.broadcast %60 : vector<1x128xf32> to vector<16x128xf32>
    %64 = arith.addf %62, %63 : vector<16x128xf32>
    %cst_32 = arith.constant 0.000000e+00 : f32
    %65 = vector.broadcast %cst_32 : f32 to vector<16x128xf32>
    %66 = arith.maximumf %64, %65 : vector<16x128xf32>
    %c2 = arith.constant 2 : index
    %c0_33 = arith.constant 0 : index
    %c0_34 = arith.constant 0 : index
    %67 = vector.load %arg2[%c2, %c0_33, %c0_34] : memref<10x128x128xbf16, #tpu.memory_space<vmem>>, vector<1x128x128xbf16>
    %68 = vector.shape_cast %67 : vector<1x128x128xbf16> to vector<128x128xbf16>
    %69 = arith.extf %68 : vector<128x128xbf16> to vector<128x128xf32>
    %c0_35 = arith.constant 0 : index
    %c2_36 = arith.constant 2 : index
    %c0_37 = arith.constant 0 : index
    %70 = vector.load %arg3[%c0_35, %c2_36, %c0_37] : memref<2x16x128xf32, #tpu.memory_space<vmem>>, vector<1x1x128xf32>
    %71 = vector.shape_cast %70 : vector<1x1x128xf32> to vector<1x128xf32>
    %c1_38 = arith.constant 1 : index
    %c2_39 = arith.constant 2 : index
    %c0_40 = arith.constant 0 : index
    %72 = vector.load %arg3[%c1_38, %c2_39, %c0_40] : memref<2x16x128xf32, #tpu.memory_space<vmem>>, vector<1x1x128xf32>
    %73 = vector.shape_cast %72 : vector<1x1x128xf32> to vector<1x128xf32>
    %cst_41 = arith.constant dense<0.000000e+00> : vector<16x128xf32>
    %74 = tpu.matmul %66, %69, %cst_41 {dimension_numbers = #tpu.dot_dimension_numbers<[1], [0], [0], [1], [0, 0, 1, 1], [], []>} : vector<16x128xf32>, vector<128x128xf32>, vector<16x128xf32> -> vector<16x128xf32>
    %cst_42 = arith.constant dense<0.000000e+00> : vector<128xf32>
    %75 = vector.multi_reduction <add>, %74, %cst_42 [0] : vector<16x128xf32> to vector<128xf32>
    %76 = vector.shape_cast %75 : vector<128xf32> to vector<1x128xf32>
    %cst_43 = arith.constant 1.600000e+01 : f32
    %77 = vector.broadcast %cst_43 : f32 to vector<1x128xf32>
    %78 = arith.divf %76, %77 : vector<1x128xf32>
    %79 = arith.mulf %74, %74 : vector<16x128xf32>
    %cst_44 = arith.constant dense<0.000000e+00> : vector<128xf32>
    %80 = vector.multi_reduction <add>, %79, %cst_44 [0] : vector<16x128xf32> to vector<128xf32>
    %81 = vector.shape_cast %80 : vector<128xf32> to vector<1x128xf32>
    %cst_45 = arith.constant 1.600000e+01 : f32
    %82 = vector.broadcast %cst_45 : f32 to vector<1x128xf32>
    %83 = arith.divf %81, %82 : vector<1x128xf32>
    %84 = arith.mulf %78, %78 : vector<1x128xf32>
    %85 = arith.subf %83, %84 : vector<1x128xf32>
    %cst_46 = arith.constant 0.000000e+00 : f32
    %86 = vector.broadcast %cst_46 : f32 to vector<1x128xf32>
    %87 = arith.maximumf %85, %86 : vector<1x128xf32>
    %cst_47 = arith.constant 9.99999974E-6 : f32
    %88 = vector.broadcast %cst_47 : f32 to vector<1x128xf32>
    %89 = arith.addf %87, %88 : vector<1x128xf32>
    %90 = math.rsqrt %89 : vector<1x128xf32>
    %91 = arith.mulf %71, %90 : vector<1x128xf32>
    %92 = arith.mulf %78, %91 : vector<1x128xf32>
    %93 = arith.subf %73, %92 : vector<1x128xf32>
    %94 = vector.broadcast %91 : vector<1x128xf32> to vector<16x128xf32>
    %95 = arith.mulf %74, %94 : vector<16x128xf32>
    %96 = vector.broadcast %93 : vector<1x128xf32> to vector<16x128xf32>
    %97 = arith.addf %95, %96 : vector<16x128xf32>
    %cst_48 = arith.constant 0.000000e+00 : f32
    %98 = vector.broadcast %cst_48 : f32 to vector<16x128xf32>
    %99 = arith.maximumf %97, %98 : vector<16x128xf32>
    %c3 = arith.constant 3 : index
    %c0_49 = arith.constant 0 : index
    %c0_50 = arith.constant 0 : index
    %100 = vector.load %arg2[%c3, %c0_49, %c0_50] : memref<10x128x128xbf16, #tpu.memory_space<vmem>>, vector<1x128x128xbf16>
    %101 = vector.shape_cast %100 : vector<1x128x128xbf16> to vector<128x128xbf16>
    %102 = arith.extf %101 : vector<128x128xbf16> to vector<128x128xf32>
    %c0_51 = arith.constant 0 : index
    %c3_52 = arith.constant 3 : index
    %c0_53 = arith.constant 0 : index
    %103 = vector.load %arg3[%c0_51, %c3_52, %c0_53] : memref<2x16x128xf32, #tpu.memory_space<vmem>>, vector<1x1x128xf32>
    %104 = vector.shape_cast %103 : vector<1x1x128xf32> to vector<1x128xf32>
    %c1_54 = arith.constant 1 : index
    %c3_55 = arith.constant 3 : index
    %c0_56 = arith.constant 0 : index
    %105 = vector.load %arg3[%c1_54, %c3_55, %c0_56] : memref<2x16x128xf32, #tpu.memory_space<vmem>>, vector<1x1x128xf32>
    %106 = vector.shape_cast %105 : vector<1x1x128xf32> to vector<1x128xf32>
    %cst_57 = arith.constant dense<0.000000e+00> : vector<16x128xf32>
    %107 = tpu.matmul %99, %102, %cst_57 {dimension_numbers = #tpu.dot_dimension_numbers<[1], [0], [0], [1], [0, 0, 1, 1], [], []>} : vector<16x128xf32>, vector<128x128xf32>, vector<16x128xf32> -> vector<16x128xf32>
    %cst_58 = arith.constant dense<0.000000e+00> : vector<128xf32>
    %108 = vector.multi_reduction <add>, %107, %cst_58 [0] : vector<16x128xf32> to vector<128xf32>
    %109 = vector.shape_cast %108 : vector<128xf32> to vector<1x128xf32>
    %cst_59 = arith.constant 1.600000e+01 : f32
    %110 = vector.broadcast %cst_59 : f32 to vector<1x128xf32>
    %111 = arith.divf %109, %110 : vector<1x128xf32>
    %112 = arith.mulf %107, %107 : vector<16x128xf32>
    %cst_60 = arith.constant dense<0.000000e+00> : vector<128xf32>
    %113 = vector.multi_reduction <add>, %112, %cst_60 [0] : vector<16x128xf32> to vector<128xf32>
    %114 = vector.shape_cast %113 : vector<128xf32> to vector<1x128xf32>
    %cst_61 = arith.constant 1.600000e+01 : f32
    %115 = vector.broadcast %cst_61 : f32 to vector<1x128xf32>
    %116 = arith.divf %114, %115 : vector<1x128xf32>
    %117 = arith.mulf %111, %111 : vector<1x128xf32>
    %118 = arith.subf %116, %117 : vector<1x128xf32>
    %cst_62 = arith.constant 0.000000e+00 : f32
    %119 = vector.broadcast %cst_62 : f32 to vector<1x128xf32>
    %120 = arith.maximumf %118, %119 : vector<1x128xf32>
    %cst_63 = arith.constant 9.99999974E-6 : f32
    %121 = vector.broadcast %cst_63 : f32 to vector<1x128xf32>
    %122 = arith.addf %120, %121 : vector<1x128xf32>
    %123 = math.rsqrt %122 : vector<1x128xf32>
    %124 = arith.mulf %104, %123 : vector<1x128xf32>
    %125 = arith.mulf %111, %124 : vector<1x128xf32>
    %126 = arith.subf %106, %125 : vector<1x128xf32>
    %127 = vector.broadcast %124 : vector<1x128xf32> to vector<16x128xf32>
    %128 = arith.mulf %107, %127 : vector<16x128xf32>
    %129 = vector.broadcast %126 : vector<1x128xf32> to vector<16x128xf32>
    %130 = arith.addf %128, %129 : vector<16x128xf32>
    %cst_64 = arith.constant 0.000000e+00 : f32
    %131 = vector.broadcast %cst_64 : f32 to vector<16x128xf32>
    %132 = arith.maximumf %130, %131 : vector<16x128xf32>
    %c4 = arith.constant 4 : index
    %c0_65 = arith.constant 0 : index
    %c0_66 = arith.constant 0 : index
    %133 = vector.load %arg2[%c4, %c0_65, %c0_66] : memref<10x128x128xbf16, #tpu.memory_space<vmem>>, vector<1x128x128xbf16>
    %134 = vector.shape_cast %133 : vector<1x128x128xbf16> to vector<128x128xbf16>
    %135 = arith.extf %134 : vector<128x128xbf16> to vector<128x128xf32>
    %c0_67 = arith.constant 0 : index
    %c4_68 = arith.constant 4 : index
    %c0_69 = arith.constant 0 : index
    %136 = vector.load %arg3[%c0_67, %c4_68, %c0_69] : memref<2x16x128xf32, #tpu.memory_space<vmem>>, vector<1x1x128xf32>
    %137 = vector.shape_cast %136 : vector<1x1x128xf32> to vector<1x128xf32>
    %c1_70 = arith.constant 1 : index
    %c4_71 = arith.constant 4 : index
    %c0_72 = arith.constant 0 : index
    %138 = vector.load %arg3[%c1_70, %c4_71, %c0_72] : memref<2x16x128xf32, #tpu.memory_space<vmem>>, vector<1x1x128xf32>
    %139 = vector.shape_cast %138 : vector<1x1x128xf32> to vector<1x128xf32>
    %cst_73 = arith.constant dense<0.000000e+00> : vector<16x128xf32>
    %140 = tpu.matmul %132, %135, %cst_73 {dimension_numbers = #tpu.dot_dimension_numbers<[1], [0], [0], [1], [0, 0, 1, 1], [], []>} : vector<16x128xf32>, vector<128x128xf32>, vector<16x128xf32> -> vector<16x128xf32>
    %cst_74 = arith.constant dense<0.000000e+00> : vector<128xf32>
    %141 = vector.multi_reduction <add>, %140, %cst_74 [0] : vector<16x128xf32> to vector<128xf32>
    %142 = vector.shape_cast %141 : vector<128xf32> to vector<1x128xf32>
    %cst_75 = arith.constant 1.600000e+01 : f32
    %143 = vector.broadcast %cst_75 : f32 to vector<1x128xf32>
    %144 = arith.divf %142, %143 : vector<1x128xf32>
    %145 = arith.mulf %140, %140 : vector<16x128xf32>
    %cst_76 = arith.constant dense<0.000000e+00> : vector<128xf32>
    %146 = vector.multi_reduction <add>, %145, %cst_76 [0] : vector<16x128xf32> to vector<128xf32>
    %147 = vector.shape_cast %146 : vector<128xf32> to vector<1x128xf32>
    %cst_77 = arith.constant 1.600000e+01 : f32
    %148 = vector.broadcast %cst_77 : f32 to vector<1x128xf32>
    %149 = arith.divf %147, %148 : vector<1x128xf32>
    %150 = arith.mulf %144, %144 : vector<1x128xf32>
    %151 = arith.subf %149, %150 : vector<1x128xf32>
    %cst_78 = arith.constant 0.000000e+00 : f32
    %152 = vector.broadcast %cst_78 : f32 to vector<1x128xf32>
    %153 = arith.maximumf %151, %152 : vector<1x128xf32>
    %cst_79 = arith.constant 9.99999974E-6 : f32
    %154 = vector.broadcast %cst_79 : f32 to vector<1x128xf32>
    %155 = arith.addf %153, %154 : vector<1x128xf32>
    %156 = math.rsqrt %155 : vector<1x128xf32>
    %157 = arith.mulf %137, %156 : vector<1x128xf32>
    %158 = arith.mulf %144, %157 : vector<1x128xf32>
    %159 = arith.subf %139, %158 : vector<1x128xf32>
    %160 = vector.broadcast %157 : vector<1x128xf32> to vector<16x128xf32>
    %161 = arith.mulf %140, %160 : vector<16x128xf32>
    %162 = vector.broadcast %159 : vector<1x128xf32> to vector<16x128xf32>
    %163 = arith.addf %161, %162 : vector<16x128xf32>
    %cst_80 = arith.constant 0.000000e+00 : f32
    %164 = vector.broadcast %cst_80 : f32 to vector<16x128xf32>
    %165 = arith.maximumf %163, %164 : vector<16x128xf32>
    %c5 = arith.constant 5 : index
    %c0_81 = arith.constant 0 : index
    %c0_82 = arith.constant 0 : index
    %166 = vector.load %arg2[%c5, %c0_81, %c0_82] : memref<10x128x128xbf16, #tpu.memory_space<vmem>>, vector<1x128x128xbf16>
    %167 = vector.shape_cast %166 : vector<1x128x128xbf16> to vector<128x128xbf16>
    %168 = arith.extf %167 : vector<128x128xbf16> to vector<128x128xf32>
    %c0_83 = arith.constant 0 : index
    %c5_84 = arith.constant 5 : index
    %c0_85 = arith.constant 0 : index
    %169 = vector.load %arg3[%c0_83, %c5_84, %c0_85] : memref<2x16x128xf32, #tpu.memory_space<vmem>>, vector<1x1x128xf32>
    %170 = vector.shape_cast %169 : vector<1x1x128xf32> to vector<1x128xf32>
    %c1_86 = arith.constant 1 : index
    %c5_87 = arith.constant 5 : index
    %c0_88 = arith.constant 0 : index
    %171 = vector.load %arg3[%c1_86, %c5_87, %c0_88] : memref<2x16x128xf32, #tpu.memory_space<vmem>>, vector<1x1x128xf32>
    %172 = vector.shape_cast %171 : vector<1x1x128xf32> to vector<1x128xf32>
    %cst_89 = arith.constant dense<0.000000e+00> : vector<16x128xf32>
    %173 = tpu.matmul %165, %168, %cst_89 {dimension_numbers = #tpu.dot_dimension_numbers<[1], [0], [0], [1], [0, 0, 1, 1], [], []>} : vector<16x128xf32>, vector<128x128xf32>, vector<16x128xf32> -> vector<16x128xf32>
    %cst_90 = arith.constant dense<0.000000e+00> : vector<128xf32>
    %174 = vector.multi_reduction <add>, %173, %cst_90 [0] : vector<16x128xf32> to vector<128xf32>
    %175 = vector.shape_cast %174 : vector<128xf32> to vector<1x128xf32>
    %cst_91 = arith.constant 1.600000e+01 : f32
    %176 = vector.broadcast %cst_91 : f32 to vector<1x128xf32>
    %177 = arith.divf %175, %176 : vector<1x128xf32>
    %178 = arith.mulf %173, %173 : vector<16x128xf32>
    %cst_92 = arith.constant dense<0.000000e+00> : vector<128xf32>
    %179 = vector.multi_reduction <add>, %178, %cst_92 [0] : vector<16x128xf32> to vector<128xf32>
    %180 = vector.shape_cast %179 : vector<128xf32> to vector<1x128xf32>
    %cst_93 = arith.constant 1.600000e+01 : f32
    %181 = vector.broadcast %cst_93 : f32 to vector<1x128xf32>
    %182 = arith.divf %180, %181 : vector<1x128xf32>
    %183 = arith.mulf %177, %177 : vector<1x128xf32>
    %184 = arith.subf %182, %183 : vector<1x128xf32>
    %cst_94 = arith.constant 0.000000e+00 : f32
    %185 = vector.broadcast %cst_94 : f32 to vector<1x128xf32>
    %186 = arith.maximumf %184, %185 : vector<1x128xf32>
    %cst_95 = arith.constant 9.99999974E-6 : f32
    %187 = vector.broadcast %cst_95 : f32 to vector<1x128xf32>
    %188 = arith.addf %186, %187 : vector<1x128xf32>
    %189 = math.rsqrt %188 : vector<1x128xf32>
    %190 = arith.mulf %170, %189 : vector<1x128xf32>
    %191 = arith.mulf %177, %190 : vector<1x128xf32>
    %192 = arith.subf %172, %191 : vector<1x128xf32>
    %193 = vector.broadcast %190 : vector<1x128xf32> to vector<16x128xf32>
    %194 = arith.mulf %173, %193 : vector<16x128xf32>
    %195 = vector.broadcast %192 : vector<1x128xf32> to vector<16x128xf32>
    %196 = arith.addf %194, %195 : vector<16x128xf32>
    %cst_96 = arith.constant 0.000000e+00 : f32
    %197 = vector.broadcast %cst_96 : f32 to vector<16x128xf32>
    %198 = arith.maximumf %196, %197 : vector<16x128xf32>
    %c6 = arith.constant 6 : index
    %c0_97 = arith.constant 0 : index
    %c0_98 = arith.constant 0 : index
    %199 = vector.load %arg2[%c6, %c0_97, %c0_98] : memref<10x128x128xbf16, #tpu.memory_space<vmem>>, vector<1x128x128xbf16>
    %200 = vector.shape_cast %199 : vector<1x128x128xbf16> to vector<128x128xbf16>
    %201 = arith.extf %200 : vector<128x128xbf16> to vector<128x128xf32>
    %c0_99 = arith.constant 0 : index
    %c6_100 = arith.constant 6 : index
    %c0_101 = arith.constant 0 : index
    %202 = vector.load %arg3[%c0_99, %c6_100, %c0_101] : memref<2x16x128xf32, #tpu.memory_space<vmem>>, vector<1x1x128xf32>
    %203 = vector.shape_cast %202 : vector<1x1x128xf32> to vector<1x128xf32>
    %c1_102 = arith.constant 1 : index
    %c6_103 = arith.constant 6 : index
    %c0_104 = arith.constant 0 : index
    %204 = vector.load %arg3[%c1_102, %c6_103, %c0_104] : memref<2x16x128xf32, #tpu.memory_space<vmem>>, vector<1x1x128xf32>
    %205 = vector.shape_cast %204 : vector<1x1x128xf32> to vector<1x128xf32>
    %cst_105 = arith.constant dense<0.000000e+00> : vector<16x128xf32>
    %206 = tpu.matmul %198, %201, %cst_105 {dimension_numbers = #tpu.dot_dimension_numbers<[1], [0], [0], [1], [0, 0, 1, 1], [], []>} : vector<16x128xf32>, vector<128x128xf32>, vector<16x128xf32> -> vector<16x128xf32>
    %cst_106 = arith.constant dense<0.000000e+00> : vector<128xf32>
    %207 = vector.multi_reduction <add>, %206, %cst_106 [0] : vector<16x128xf32> to vector<128xf32>
    %208 = vector.shape_cast %207 : vector<128xf32> to vector<1x128xf32>
    %cst_107 = arith.constant 1.600000e+01 : f32
    %209 = vector.broadcast %cst_107 : f32 to vector<1x128xf32>
    %210 = arith.divf %208, %209 : vector<1x128xf32>
    %211 = arith.mulf %206, %206 : vector<16x128xf32>
    %cst_108 = arith.constant dense<0.000000e+00> : vector<128xf32>
    %212 = vector.multi_reduction <add>, %211, %cst_108 [0] : vector<16x128xf32> to vector<128xf32>
    %213 = vector.shape_cast %212 : vector<128xf32> to vector<1x128xf32>
    %cst_109 = arith.constant 1.600000e+01 : f32
    %214 = vector.broadcast %cst_109 : f32 to vector<1x128xf32>
    %215 = arith.divf %213, %214 : vector<1x128xf32>
    %216 = arith.mulf %210, %210 : vector<1x128xf32>
    %217 = arith.subf %215, %216 : vector<1x128xf32>
    %cst_110 = arith.constant 0.000000e+00 : f32
    %218 = vector.broadcast %cst_110 : f32 to vector<1x128xf32>
    %219 = arith.maximumf %217, %218 : vector<1x128xf32>
    %cst_111 = arith.constant 9.99999974E-6 : f32
    %220 = vector.broadcast %cst_111 : f32 to vector<1x128xf32>
    %221 = arith.addf %219, %220 : vector<1x128xf32>
    %222 = math.rsqrt %221 : vector<1x128xf32>
    %223 = arith.mulf %203, %222 : vector<1x128xf32>
    %224 = arith.mulf %210, %223 : vector<1x128xf32>
    %225 = arith.subf %205, %224 : vector<1x128xf32>
    %226 = vector.broadcast %223 : vector<1x128xf32> to vector<16x128xf32>
    %227 = arith.mulf %206, %226 : vector<16x128xf32>
    %228 = vector.broadcast %225 : vector<1x128xf32> to vector<16x128xf32>
    %229 = arith.addf %227, %228 : vector<16x128xf32>
    %cst_112 = arith.constant 0.000000e+00 : f32
    %230 = vector.broadcast %cst_112 : f32 to vector<16x128xf32>
    %231 = arith.maximumf %229, %230 : vector<16x128xf32>
    %c7 = arith.constant 7 : index
    %c0_113 = arith.constant 0 : index
    %c0_114 = arith.constant 0 : index
    %232 = vector.load %arg2[%c7, %c0_113, %c0_114] : memref<10x128x128xbf16, #tpu.memory_space<vmem>>, vector<1x128x128xbf16>
    %233 = vector.shape_cast %232 : vector<1x128x128xbf16> to vector<128x128xbf16>
    %234 = arith.extf %233 : vector<128x128xbf16> to vector<128x128xf32>
    %c0_115 = arith.constant 0 : index
    %c7_116 = arith.constant 7 : index
    %c0_117 = arith.constant 0 : index
    %235 = vector.load %arg3[%c0_115, %c7_116, %c0_117] : memref<2x16x128xf32, #tpu.memory_space<vmem>>, vector<1x1x128xf32>
    %236 = vector.shape_cast %235 : vector<1x1x128xf32> to vector<1x128xf32>
    %c1_118 = arith.constant 1 : index
    %c7_119 = arith.constant 7 : index
    %c0_120 = arith.constant 0 : index
    %237 = vector.load %arg3[%c1_118, %c7_119, %c0_120] : memref<2x16x128xf32, #tpu.memory_space<vmem>>, vector<1x1x128xf32>
    %238 = vector.shape_cast %237 : vector<1x1x128xf32> to vector<1x128xf32>
    %cst_121 = arith.constant dense<0.000000e+00> : vector<16x128xf32>
    %239 = tpu.matmul %231, %234, %cst_121 {dimension_numbers = #tpu.dot_dimension_numbers<[1], [0], [0], [1], [0, 0, 1, 1], [], []>} : vector<16x128xf32>, vector<128x128xf32>, vector<16x128xf32> -> vector<16x128xf32>
    %cst_122 = arith.constant dense<0.000000e+00> : vector<128xf32>
    %240 = vector.multi_reduction <add>, %239, %cst_122 [0] : vector<16x128xf32> to vector<128xf32>
    %241 = vector.shape_cast %240 : vector<128xf32> to vector<1x128xf32>
    %cst_123 = arith.constant 1.600000e+01 : f32
    %242 = vector.broadcast %cst_123 : f32 to vector<1x128xf32>
    %243 = arith.divf %241, %242 : vector<1x128xf32>
    %244 = arith.mulf %239, %239 : vector<16x128xf32>
    %cst_124 = arith.constant dense<0.000000e+00> : vector<128xf32>
    %245 = vector.multi_reduction <add>, %244, %cst_124 [0] : vector<16x128xf32> to vector<128xf32>
    %246 = vector.shape_cast %245 : vector<128xf32> to vector<1x128xf32>
    %cst_125 = arith.constant 1.600000e+01 : f32
    %247 = vector.broadcast %cst_125 : f32 to vector<1x128xf32>
    %248 = arith.divf %246, %247 : vector<1x128xf32>
    %249 = arith.mulf %243, %243 : vector<1x128xf32>
    %250 = arith.subf %248, %249 : vector<1x128xf32>
    %cst_126 = arith.constant 0.000000e+00 : f32
    %251 = vector.broadcast %cst_126 : f32 to vector<1x128xf32>
    %252 = arith.maximumf %250, %251 : vector<1x128xf32>
    %cst_127 = arith.constant 9.99999974E-6 : f32
    %253 = vector.broadcast %cst_127 : f32 to vector<1x128xf32>
    %254 = arith.addf %252, %253 : vector<1x128xf32>
    %255 = math.rsqrt %254 : vector<1x128xf32>
    %256 = arith.mulf %236, %255 : vector<1x128xf32>
    %257 = arith.mulf %243, %256 : vector<1x128xf32>
    %258 = arith.subf %238, %257 : vector<1x128xf32>
    %259 = vector.broadcast %256 : vector<1x128xf32> to vector<16x128xf32>
    %260 = arith.mulf %239, %259 : vector<16x128xf32>
    %261 = vector.broadcast %258 : vector<1x128xf32> to vector<16x128xf32>
    %262 = arith.addf %260, %261 : vector<16x128xf32>
    %cst_128 = arith.constant 0.000000e+00 : f32
    %263 = vector.broadcast %cst_128 : f32 to vector<16x128xf32>
    %264 = arith.maximumf %262, %263 : vector<16x128xf32>
    %c8 = arith.constant 8 : index
    %c0_129 = arith.constant 0 : index
    %c0_130 = arith.constant 0 : index
    %265 = vector.load %arg2[%c8, %c0_129, %c0_130] : memref<10x128x128xbf16, #tpu.memory_space<vmem>>, vector<1x128x128xbf16>
    %266 = vector.shape_cast %265 : vector<1x128x128xbf16> to vector<128x128xbf16>
    %267 = arith.extf %266 : vector<128x128xbf16> to vector<128x128xf32>
    %c0_131 = arith.constant 0 : index
    %c8_132 = arith.constant 8 : index
    %c0_133 = arith.constant 0 : index
    %268 = vector.load %arg3[%c0_131, %c8_132, %c0_133] : memref<2x16x128xf32, #tpu.memory_space<vmem>>, vector<1x1x128xf32>
    %269 = vector.shape_cast %268 : vector<1x1x128xf32> to vector<1x128xf32>
    %c1_134 = arith.constant 1 : index
    %c8_135 = arith.constant 8 : index
    %c0_136 = arith.constant 0 : index
    %270 = vector.load %arg3[%c1_134, %c8_135, %c0_136] : memref<2x16x128xf32, #tpu.memory_space<vmem>>, vector<1x1x128xf32>
    %271 = vector.shape_cast %270 : vector<1x1x128xf32> to vector<1x128xf32>
    %cst_137 = arith.constant dense<0.000000e+00> : vector<16x128xf32>
    %272 = tpu.matmul %264, %267, %cst_137 {dimension_numbers = #tpu.dot_dimension_numbers<[1], [0], [0], [1], [0, 0, 1, 1], [], []>} : vector<16x128xf32>, vector<128x128xf32>, vector<16x128xf32> -> vector<16x128xf32>
    %cst_138 = arith.constant dense<0.000000e+00> : vector<128xf32>
    %273 = vector.multi_reduction <add>, %272, %cst_138 [0] : vector<16x128xf32> to vector<128xf32>
    %274 = vector.shape_cast %273 : vector<128xf32> to vector<1x128xf32>
    %cst_139 = arith.constant 1.600000e+01 : f32
    %275 = vector.broadcast %cst_139 : f32 to vector<1x128xf32>
    %276 = arith.divf %274, %275 : vector<1x128xf32>
    %277 = arith.mulf %272, %272 : vector<16x128xf32>
    %cst_140 = arith.constant dense<0.000000e+00> : vector<128xf32>
    %278 = vector.multi_reduction <add>, %277, %cst_140 [0] : vector<16x128xf32> to vector<128xf32>
    %279 = vector.shape_cast %278 : vector<128xf32> to vector<1x128xf32>
    %cst_141 = arith.constant 1.600000e+01 : f32
    %280 = vector.broadcast %cst_141 : f32 to vector<1x128xf32>
    %281 = arith.divf %279, %280 : vector<1x128xf32>
    %282 = arith.mulf %276, %276 : vector<1x128xf32>
    %283 = arith.subf %281, %282 : vector<1x128xf32>
    %cst_142 = arith.constant 0.000000e+00 : f32
    %284 = vector.broadcast %cst_142 : f32 to vector<1x128xf32>
    %285 = arith.maximumf %283, %284 : vector<1x128xf32>
    %cst_143 = arith.constant 9.99999974E-6 : f32
    %286 = vector.broadcast %cst_143 : f32 to vector<1x128xf32>
    %287 = arith.addf %285, %286 : vector<1x128xf32>
    %288 = math.rsqrt %287 : vector<1x128xf32>
    %289 = arith.mulf %269, %288 : vector<1x128xf32>
    %290 = arith.mulf %276, %289 : vector<1x128xf32>
    %291 = arith.subf %271, %290 : vector<1x128xf32>
    %292 = vector.broadcast %289 : vector<1x128xf32> to vector<16x128xf32>
    %293 = arith.mulf %272, %292 : vector<16x128xf32>
    %294 = vector.broadcast %291 : vector<1x128xf32> to vector<16x128xf32>
    %295 = arith.addf %293, %294 : vector<16x128xf32>
    %cst_144 = arith.constant 0.000000e+00 : f32
    %296 = vector.broadcast %cst_144 : f32 to vector<16x128xf32>
    %297 = arith.maximumf %295, %296 : vector<16x128xf32>
    %c9 = arith.constant 9 : index
    %c0_145 = arith.constant 0 : index
    %c0_146 = arith.constant 0 : index
    %298 = vector.load %arg2[%c9, %c0_145, %c0_146] : memref<10x128x128xbf16, #tpu.memory_space<vmem>>, vector<1x128x128xbf16>
    %299 = vector.shape_cast %298 : vector<1x128x128xbf16> to vector<128x128xbf16>
    %300 = arith.extf %299 : vector<128x128xbf16> to vector<128x128xf32>
    %c1_147 = arith.constant 1 : index
    %c9_148 = arith.constant 9 : index
    %c0_149 = arith.constant 0 : index
    %301 = vector.load %arg3[%c1_147, %c9_148, %c0_149] : memref<2x16x128xf32, #tpu.memory_space<vmem>>, vector<1x1x128xf32>
    %302 = vector.shape_cast %301 : vector<1x1x128xf32> to vector<1x128xf32>
    %cst_150 = arith.constant dense<0.000000e+00> : vector<16x128xf32>
    %303 = tpu.matmul %297, %300, %cst_150 {dimension_numbers = #tpu.dot_dimension_numbers<[1], [0], [0], [1], [0, 0, 1, 1], [], []>} : vector<16x128xf32>, vector<128x128xf32>, vector<16x128xf32> -> vector<16x128xf32>
    %304 = vector.broadcast %302 : vector<1x128xf32> to vector<16x128xf32>
    %305 = arith.addf %303, %304 : vector<16x128xf32>
    %306 = vector.extract_strided_slice %305 {offsets = [0, 0], sizes = [16, 64], strides = [1, 1]} : vector<16x128xf32> to vector<16x64xf32>
    %c0_151 = arith.constant 0 : index
    %c0_152 = arith.constant 0 : index
    %307 = vector.load %arg4[%c0_151, %c0_152] : memref<16x64xf32, #tpu.memory_space<vmem>>, vector<16x64xf32>
    tpu.vector_store %arg4[%c0_151, %c0_152], %306 {strides = array<i32>} : memref<16x64xf32, #tpu.memory_space<vmem>>, vector<16x64xf32>,
    return
  }
  func.func @transform_0(%arg0: i32) -> (i32, i32) {
    %c0_i32 = arith.constant 0 : i32
    %c0_i32_0 = arith.constant 0 : i32
    %c0_i32_1 = arith.constant 0 : i32
    return %c0_i32, %c0_i32_0 : i32, i32
  }
  func.func @transform_1(%arg0: i32) -> (i32, i32, i32) {
    %c0_i32 = arith.constant 0 : i32
    %c0_i32_0 = arith.constant 0 : i32
    %c0_i32_1 = arith.constant 0 : i32
    %c0_i32_2 = arith.constant 0 : i32
    return %c0_i32, %c0_i32_0, %c0_i32_1 : i32, i32, i32
  }
  func.func @transform_2(%arg0: i32) -> (i32, i32, i32) {
    %c0_i32 = arith.constant 0 : i32
    %c0_i32_0 = arith.constant 0 : i32
    %c0_i32_1 = arith.constant 0 : i32
    %c0_i32_2 = arith.constant 0 : i32
    return %c0_i32, %c0_i32_0, %c0_i32_1 : i32, i32, i32
  }
  func.func @transform_3(%arg0: i32) -> (i32, i32) {
    %c0_i32 = arith.constant 0 : i32
    %c0_i32_0 = arith.constant 0 : i32
    %c0_i32_1 = arith.constant 0 : i32
    return %c0_i32, %c0_i32_0 : i32, i32
  }
}

</mosaic_0001>

<bundles_post_ra>
// kernel: autoencoder_forward.1
= control target key start
LH: loop header
LB: loop body
LE: loop exit
PB: predicated region body
PF: predicated region fallthrough
CT: control target
= control target key end

     0   :  { %8 = vsyncpa [#allocation3], 0  ;;  %s2597_s0 = inlined_call_operand.hbm [shape: f32[16,64], index: 0, kind: input, shape index: {}]   ;;  %s2598_s1 = inlined_call_operand.hbm [shape: bf16[10,128,128], index: 1, kind: input, shape index: {}]   ;;  %s2599_s2 = inlined_call_operand.hbm [shape: f32[2,16,128], index: 2, kind: input, shape index: {}]   ;;  %s2600_s3 = inlined_call_operand.hbm [shape: f32[16,64], index: 3, kind: output, shape index: {}]  }
   0x1   :  { %9 = vsyncpa [#allocation6], 0 }
   0x2   :  { %10 = vsyncpa [#allocation4], 0  ;;  %s2524_s12 = smov [#allocation5]  }
   0x3   :  { %s28_s13 = sshll.u32 %s2524_s12, 4  ;;  %s29_s13 = int_to_ptr.vmem [resolvable:$true] %s28_s13 }
   0x4   :  { %s2446_s14 = scalar_lea.vmem %s29_s13, 10240  ;;  %p2451_p1 = scmp.lt.s32.totalorder %s29_s13, %s29_s13 }
   0x5   :  { %p2447_p0 = scmp.ne.s32.totalorder %s29_s13, %s2446_s14  ;;  %p2452_p2 = scmp.lt.s32.totalorder %s2446_s14, %s2446_s14 }
   0x7   :  { %p2453_p3 = por %p2452_p2, %p2451_p1 }
   0x9   :  { %p2454_p4 = pnand %p2453_p3, %p2447_p0 }
   0xb   :  { %2457 = shalt.err (!%p2454_p4)
}
   0xc   :  { %s2525_s15 = smov 64   ;;  %s2526_s16 = smov 4  }
   0xd   :  { %34 = dma.hbm_to_vmem [thread:$0]  %s2598_s1, 10240, %s29_s13, [#allocation6], %s2525_s15, %s2525_s15, %s2526_s16  }
   0xe   :  { %s2527_s19 = smov [#allocation2]  }
   0xf   :  { %s16_s20 = sshll.u32 %s2527_s19, 4  ;;  %s17_s20 = int_to_ptr.vmem [resolvable:$true] %s16_s20 }
  0x10   :  { %s2466_s21 = scalar_lea.vmem %s17_s20, 256  ;;  %p2471_p6 = scmp.lt.s32.totalorder %s17_s20, %s17_s20 }
  0x11   :  { %p2467_p5 = scmp.ne.s32.totalorder %s17_s20, %s2466_s21  ;;  %p2472_p7 = scmp.lt.s32.totalorder %s2466_s21, %s2466_s21 }
  0x13   :  { %p2473_p8 = por %p2472_p7, %p2471_p6 }
  0x15   :  { %p2474_p9 = pnand %p2473_p8, %p2467_p5 }
  0x17   :  { %2477 = shalt.err (!%p2474_p9)
}
  0x18   :  { %s2528_s22 = smov 128   ;;  %s2529_s23 = smov 8  }
  0x19   :  { %22 = dma.hbm_to_vmem [thread:$0]  %s2597_s0, 256, %s17_s20, [#allocation3], %s2528_s22, %s2528_s22, %s2529_s23  }
  0x1a   :  { %s2530_s1 = smov [#allocation7]  }
  0x1b   :  { %s40_s26 = sshll.u32 %s2530_s1, 4  ;;  %s41_s26 = int_to_ptr.vmem [resolvable:$true] %s40_s26 }
  0x1c   :  { %s2486_s27 = scalar_lea.vmem %s41_s26, 512  ;;  %p2491_p11 = scmp.lt.s32.totalorder %s41_s26, %s41_s26 }
  0x1d   :  { %p2487_p10 = scmp.ne.s32.totalorder %s41_s26, %s2486_s27  ;;  %p2492_p12 = scmp.lt.s32.totalorder %s2486_s27, %s2486_s27 }
  0x1f   :  { %p2493_p13 = por %p2492_p12, %p2491_p11 }
  0x21   :  { %p2494_p0 = pnand %p2493_p13, %p2487_p10 }
  0x23   :  { %2497 = shalt.err (!%p2494_p0)
}
  0x24   :  { %46 = dma.hbm_to_vmem [thread:$0]  %s2599_s2, 512, %s41_s26, [#allocation6], %s2528_s22, %s2528_s22, %s2529_s23  }
  0x25   :  { %2518 = dma.done.wait [#allocation3], 256  }
  0x26   :  { %2519 = vsyncadd [#allocation3], 4294967040 }
  0x27   :  { %2520 = dma.done.wait [#allocation6], 10752  }
  0x28   :  { %2521 = vsyncadd [#allocation6], 4294956544  ;;  %vm77_vm0 = vcmask 523264   ;;  %v1842_v0 = vld [vmem:[#allocation5 + $0x18] sm:$0xff]   ;;  %v1841_v1 = vld [vmem:[#allocation5 + $0x10] sm:$0xff]   ;;  %v186_v62 = vlaneseq  ;;  %s2531_s0 = smov [#allocation8]  }
  0x29   :  { %v1550_v2 = vunpack.c.l.bf16 %v1842_v0  ;;  %v1551_v3 = vunpack.c.h.bf16 %v1842_v0  ;;  %v56_v4 = vld [vmem:[#allocation2] sm:$0xff]  ;;  %v1547_v5 = vunpack.c.h.bf16 %v1841_v1  ;;  %v1840_v6 = vld [vmem:[#allocation5 + $0x8] sm:$0xff]   ;;  %v1546_v7 = vunpack.c.l.bf16 %v1841_v1  ;;  %v1537_v9 = vld [vmem:[#allocation5] sm:$0xff]   ;;  %s1520_s2 = sshll.u32 %s2531_s0, 4  ;;  %s1521_s2 = int_to_ptr.vmem [resolvable:$true] %s1520_s2 }
  0x2a   :  { %2094 = vmatprep.mubr.msk.f32.mxu0 %vm77_vm0, %v56_v4  ;;  %v1543_v8 = vunpack.c.h.bf16 %v1840_v6  ;;  %v1542_v10 = vunpack.c.l.bf16 %v1840_v6  ;;  %v1539_v11 = vunpack.c.h.bf16 %v1537_v9  ;;  %v1538_v12 = vunpack.c.l.bf16 %v1537_v9  ;;  %v57_v13 = vld [vmem:[#allocation2 + $0x8] sm:$0xff]  ;;  %v1848_v15 = vld [vmem:[#allocation5 + $0x70] sm:$0xff]   ;;  %v1847_v19 = vld [vmem:[#allocation5 + $0x68] sm:$0xff]   ;;  %s2498_s30 = scalar_lea.vmem %s1521_s2, 256  ;;  %p2503_p2 = scmp.lt.s32.totalorder %s1521_s2, %s1521_s2 }
  0x2b   :  { %2078 = vmatprep.subr.mxu0 %v1551_v3  ;;  %v1849_v14 = vld [vmem:[#allocation5 + $0x78] sm:$0xff]   ;;  %v1579_v18 = vunpack.c.h.bf16 %v1848_v15  ;;  %v1578_v20 = vunpack.c.l.bf16 %v1848_v15  ;;  %v1575_v21 = vunpack.c.h.bf16 %v1847_v19  ;;  %v1846_v22 = vld [vmem:[#allocation5 + $0x60] sm:$0xff]   ;;  %v1574_v23 = vunpack.c.l.bf16 %v1847_v19  ;;  %v1844_v28 = vld [vmem:[#allocation5 + $0x50] sm:$0xff]   ;;  %p2499_p1 = scmp.ne.s32.totalorder %s1521_s2, %s2498_s30  ;;  %p2504_p3 = scmp.lt.s32.totalorder %s2498_s30, %s2498_s30 }
  0x2c   :  { %2079 = vmatpush3.msra.mxu0 %v1551_v3  ;;  %v1582_v16 = vunpack.c.l.bf16 %v1849_v14  ;;  %v1583_v17 = vunpack.c.h.bf16 %v1849_v14  ;;  %v1571_v24 = vunpack.c.h.bf16 %v1846_v22  ;;  %v1845_v25 = vld [vmem:[#allocation5 + $0x58] sm:$0xff]   ;;  %v1570_v26 = vunpack.c.l.bf16 %v1846_v22  ;;  %v1843_v31 = vld [vmem:[#allocation5 + $0x48] sm:$0xff]   ;;  %v1553_v34 = vld [vmem:[#allocation5 + $0x40] sm:$0xff]  }
  0x2d   :  { %2080 = vmatprep.subr.mxu0 %v1550_v2  ;;  %v1567_v27 = vunpack.c.h.bf16 %v1845_v25  ;;  %v1566_v29 = vunpack.c.l.bf16 %v1845_v25  ;;  %v1563_v30 = vunpack.c.h.bf16 %v1844_v28  ;;  %v1562_v32 = vunpack.c.l.bf16 %v1844_v28  ;;  %v74_v0 = vld [vmem:[#allocation7] sm:$0x1]  ;;  %v76_v4 = vld [vmem:[#allocation7 + $0x10] sm:$0x1]  ;;  %v1856_v15 = vld [vmem:[#allocation5 + $0xb8] sm:$0xff]   ;;  %p2505_p4 = por %p2504_p3, %p2503_p2 }
  0x2e   :  { %2081 = vmatpush3.msra.mxu0 %v1550_v2  ;;  %2097 = vmatprep.subr.mxu1 %v1583_v17  ;;  %v1559_v33 = vunpack.c.h.bf16 %v1843_v31  ;;  %v1558_v35 = vunpack.c.l.bf16 %v1843_v31  ;;  %v1555_v36 = vunpack.c.h.bf16 %v1553_v34  ;;  %v1554_v37 = vunpack.c.l.bf16 %v1553_v34 }
  0x2f   :  { %2082 = vmatprep.subr.mxu0 %v1547_v5  ;;  %2098 = vmatpush3.msra.mxu1 %v1583_v17  ;;  %v187_v63 = vshrl.u32 %v186_v62, 7  ;;  %v1614_v17 = vunpack.c.l.bf16 %v1856_v15  ;;  %p2506_p5 = pnand %p2505_p4, %p2499_p1 }
  0x30   :  { %2083 = vmatpush3.msra.mxu0 %v1547_v5  ;;  %2099 = vmatprep.subr.mxu1 %v1582_v16 }
  0x31   :  { %2084 = vmatprep.subr.mxu0 %v1546_v7  ;;  %2100 = vmatpush3.msra.mxu1 %v1582_v16  ;;  %v2569_v1 = vsub.s32 0, %v187_v63  ;;  %v1615_v16 = vunpack.c.h.bf16 %v1856_v15  ;;  %v233_v63 = vld [vmem:[#allocation7 + $0x1] sm:$0x1] }
  0x32   :  { %2085 = vmatpush3.msra.mxu0 %v1546_v7  ;;  %2101 = vmatprep.subr.mxu1 %v1579_v18 }
  0x33   :  { %2086 = vmatprep.subr.mxu0 %v1543_v8  ;;  %2102 = vmatpush3.msra.mxu1 %v1579_v18  ;;  %v1855_v18 = vld [vmem:[#allocation5 + $0xb0] sm:$0xff]  }
  0x34   :  { %2087 = vmatpush3.msra.mxu0 %v1543_v8  ;;  %2103 = vmatprep.subr.mxu1 %v1578_v20  ;;  %v1611_v19 = vunpack.c.h.bf16 %v1855_v18 }
  0x35   :  { %2088 = vmatprep.subr.mxu0 %v1542_v10  ;;  %2104 = vmatpush3.msra.mxu1 %v1578_v20  ;;  %v1610_v20 = vunpack.c.l.bf16 %v1855_v18 }
  0x36   :  { %2089 = vmatpush3.msra.mxu0 %v1542_v10  ;;  %2105 = vmatprep.subr.mxu1 %v1575_v21 }
  0x37   :  { %2090 = vmatprep.subr.mxu0 %v1539_v11  ;;  %2106 = vmatpush3.msra.mxu1 %v1575_v21  ;;  %v1854_v21 = vld [vmem:[#allocation5 + $0xa8] sm:$0xff]  }
  0x38   :  { %2091 = vmatpush3.msra.mxu0 %v1539_v11  ;;  %2107 = vmatprep.subr.mxu1 %v1574_v23  ;;  %v1607_v22 = vunpack.c.h.bf16 %v1854_v21 }
  0x39   :  { %2092 = vmatprep.subr.mxu0 %v1538_v12  ;;  %2108 = vmatpush3.msra.mxu1 %v1574_v23  ;;  %v1606_v23 = vunpack.c.l.bf16 %v1854_v21 }
  0x3a   :  { %2093 = vmatpush3.msra.mxu0 %v1538_v12  ;;  %2109 = vmatprep.subr.mxu1 %v1571_v24 }
  0x3b   :  { %2095 = vmatmul.mubr.msk.f32.vlgmr.msra.gmra.mxu0 %vm77_vm0, %v57_v13  ;;  %2110 = vmatpush3.msra.mxu1 %v1571_v24  ;;  %v1853_v24 = vld [vmem:[#allocation5 + $0xa0] sm:$0xff]  }
  0x3c   :  { %2111 = vmatprep.subr.mxu1 %v1570_v26  ;;  %2132 = vmatprep.subr.mxu0 %v1615_v16  ;;  %v1603_v25 = vunpack.c.h.bf16 %v1853_v24 }
  0x3d   :  { %2112 = vmatpush3.msra.mxu1 %v1570_v26  ;;  %2133 = vmatpush3.msra.mxu0 %v1615_v16  ;;  %v1602_v26 = vunpack.c.l.bf16 %v1853_v24 }
  0x3e   :  { %2113 = vmatprep.subr.mxu1 %v1567_v27  ;;  %2134 = vmatprep.subr.mxu0 %v1614_v17 }
  0x3f   :  { %2114 = vmatpush3.msra.mxu1 %v1567_v27  ;;  %2135 = vmatpush3.msra.mxu0 %v1614_v17  ;;  %v1852_v27 = vld [vmem:[#allocation5 + $0x98] sm:$0xff]   ;;  %v1862_v17 = vld [vmem:[#allocation5 + $0xf0] sm:$0xff]  }
  0x40   :  { %2115 = vmatprep.subr.mxu1 %v1566_v29  ;;  %2136 = vmatprep.subr.mxu0 %v1611_v19  ;;  %v1599_v28 = vunpack.c.h.bf16 %v1852_v27  ;;  %v1643_v18 = vunpack.c.h.bf16 %v1862_v17 }
  0x41   :  { %2116 = vmatpush3.msra.mxu1 %v1566_v29  ;;  %2137 = vmatpush3.msra.mxu0 %v1611_v19  ;;  %v1598_v29 = vunpack.c.l.bf16 %v1852_v27  ;;  %v1642_v19 = vunpack.c.l.bf16 %v1862_v17 }
  0x42   :  { %2117 = vmatprep.subr.mxu1 %v1563_v30  ;;  %2138 = vmatprep.subr.mxu0 %v1610_v20 }
  0x43   :  { %2118 = vmatpush3.msra.mxu1 %v1563_v30  ;;  %2139 = vmatpush3.msra.mxu0 %v1610_v20  ;;  %v1851_v30 = vld [vmem:[#allocation5 + $0x90] sm:$0xff]   ;;  %v1861_v20 = vld [vmem:[#allocation5 + $0xe8] sm:$0xff]  }
  0x44   :  { %2119 = vmatprep.subr.mxu1 %v1562_v32  ;;  %2140 = vmatprep.subr.mxu0 %v1607_v22  ;;  %v1595_v31 = vunpack.c.h.bf16 %v1851_v30  ;;  %v1639_v21 = vunpack.c.h.bf16 %v1861_v20 }
  0x45   :  { %2120 = vmatpush3.msra.mxu1 %v1562_v32  ;;  %2141 = vmatpush3.msra.mxu0 %v1607_v22  ;;  %v1594_v32 = vunpack.c.l.bf16 %v1851_v30  ;;  %v1638_v22 = vunpack.c.l.bf16 %v1861_v20 }
  0x46   :  { %2121 = vmatprep.subr.mxu1 %v1559_v33  ;;  %2142 = vmatprep.subr.mxu0 %v1606_v23 }
  0x47   :  { %2122 = vmatpush3.msra.mxu1 %v1559_v33  ;;  %2143 = vmatpush3.msra.mxu0 %v1606_v23  ;;  %v1850_v33 = vld [vmem:[#allocation5 + $0x88] sm:$0xff]   ;;  %v1860_v23 = vld [vmem:[#allocation5 + $0xe0] sm:$0xff]  }
  0x48   :  { %2123 = vmatprep.subr.mxu1 %v1558_v35  ;;  %2144 = vmatprep.subr.mxu0 %v1603_v25  ;;  %v1591_v34 = vunpack.c.h.bf16 %v1850_v33  ;;  %v1635_v24 = vunpack.c.h.bf16 %v1860_v23 }
  0x49   :  { %2124 = vmatpush3.msra.mxu1 %v1558_v35  ;;  %2145 = vmatpush3.msra.mxu0 %v1603_v25  ;;  %v1590_v35 = vunpack.c.l.bf16 %v1850_v33  ;;  %v1634_v25 = vunpack.c.l.bf16 %v1860_v23 }
  0x4a   :  { %2125 = vmatprep.subr.mxu1 %v1555_v36  ;;  %2146 = vmatprep.subr.mxu0 %v1602_v26 }
  0x4b   :  { %2126 = vmatpush3.msra.mxu1 %v1555_v36  ;;  %2147 = vmatpush3.msra.mxu0 %v1602_v26  ;;  %v1585_v36 = vld [vmem:[#allocation5 + $0x80] sm:$0xff]   ;;  %v1859_v26 = vld [vmem:[#allocation5 + $0xd8] sm:$0xff]  }
  0x4c   :  { %2127 = vmatprep.subr.mxu1 %v1554_v37  ;;  %2148 = vmatprep.subr.mxu0 %v1599_v28  ;;  %v1631_v27 = vunpack.c.h.bf16 %v1859_v26 }
  0x4d   :  { %2128 = vmatpush3.msra.mxu1 %v1554_v37  ;;  %2149 = vmatpush3.msra.mxu0 %v1599_v28  ;;  %v1587_v37 = vunpack.c.h.bf16 %v1585_v36  ;;  %v1630_v28 = vunpack.c.l.bf16 %v1859_v26 }
  0x4e   :  { %2150 = vmatprep.subr.mxu0 %v1598_v29 }
  0x4f   :  { %2151 = vmatpush3.msra.mxu0 %v1598_v29  ;;  %v1858_v29 = vld [vmem:[#allocation5 + $0xd0] sm:$0xff]  }
  0x50   :  { %2152 = vmatprep.subr.mxu0 %v1595_v31  ;;  %v1627_v30 = vunpack.c.h.bf16 %v1858_v29 }
  0x51   :  { %2153 = vmatpush3.msra.mxu0 %v1595_v31  ;;  %v1626_v31 = vunpack.c.l.bf16 %v1858_v29 }
  0x52   :  { %2154 = vmatprep.subr.mxu0 %v1594_v32 }
  0x53   :  { %2155 = vmatpush3.msra.mxu0 %v1594_v32  ;;  %v1857_v32 = vld [vmem:[#allocation5 + $0xc8] sm:$0xff]  }
  0x54   :  { %2156 = vmatprep.subr.mxu0 %v1591_v34  ;;  %v1623_v33 = vunpack.c.h.bf16 %v1857_v32 }
  0x55   :  { %2157 = vmatpush3.msra.mxu0 %v1591_v34  ;;  %v1622_v34 = vunpack.c.l.bf16 %v1857_v32 }
  0x56   :  { %2158 = vmatprep.subr.mxu0 %v1590_v35 }
  0x57   :  { %2159 = vmatpush3.msra.mxu0 %v1590_v35  ;;  %v1617_v35 = vld [vmem:[#allocation5 + $0xc0] sm:$0xff]  }
  0x58   :  { %2160 = vmatprep.subr.mxu0 %v1587_v37 }
  0x59   :  { %2161 = vmatpush3.msra.mxu0 %v1587_v37  ;;  %v1618_v37 = vunpack.c.l.bf16 %v1617_v35 }
  0xfb   :  { %v2096_v38 = vpop.f32.mrf.mxu0 }
  0xfc   :  { %v169_v40 = vmul.f32 %v2096_v38, %v2096_v38 }
  0xfd   :  { %v150_v39 = vpop.f32.mrf.mxu0 }
  0xfe   :  { %v159_v41 = vadd.f32 %v2096_v38, %v150_v39  ;;  %v168_v42 = vmul.f32 %v150_v39, %v150_v39 }
 0x100   :  { %v160_v43 = vrot.slane %v159_v41, 4  ;;  %v170_v44 = vadd.f32 %v169_v40, %v168_v42 }
 0x102   :  { %v161_v45 = vadd.f32 %v160_v43, %v159_v41  ;;  %v171_v46 = vrot.slane %v170_v44, 4 }
 0x104   :  { %v162_v47 = vrot.slane %v161_v45, 2  ;;  %v172_v48 = vadd.f32 %v171_v46, %v170_v44 }
 0x106   :  { %v163_v49 = vadd.f32 %v162_v47, %v161_v45  ;;  %v173_v50 = vrot.slane %v172_v48, 2 }
 0x108   :  { %v164_v51 = vrot.slane %v163_v49, 1  ;;  %v174_v52 = vadd.f32 %v173_v50, %v172_v48 }
 0x10a   :  { %v175_v53 = vrot.slane %v174_v52, 1  ;;  %v165_v54 = vadd.f32 %v164_v51, %v163_v49 }
 0x10c   :  { %v176_v55 = vadd.f32 %v175_v53, %v174_v52  ;;  %v167_v56 = vmul.f32 0.0625, %v165_v54 }
 0x10e   :  { %v177_v57 = vmul.f32 0.0625, %v176_v55  ;;  %v178_v58 = vmul.f32 %v167_v56, %v167_v56 }
 0x110   :  { %v179_v59 = vsub.f32 %v177_v57, %v178_v58 }
 0x112   :  { %v180_v60 = vmax.f32 %v179_v59, 0.0 }
 0x114   :  { %v181_v61 = vadd.f32 1e-05, %v180_v60 }
 0x116   :  { %2420 = vrsqrt.f32 %v181_v61 }
 0x123   :  { %v2421_v2 = vpop.eup %2420 }
 0x124   :  { %v183_v3 = vmul.f32 %v2421_v2, %v74_v0 }
 0x126   :  { %v184_v5 = vmul.f32 %v183_v3, %v167_v56  ;;  %v189_v6 = vrot.slane %v183_v3, %v2569_v1  ;;  %v234_v3 = vld [vmem:[#allocation7 + $0x11] sm:$0x1] }
 0x128   :  { %v185_v7 = vsub.f32 %v76_v4, %v184_v5  ;;  %v190_v8 = vmul.f32 %v189_v6, %v150_v39  ;;  %v191_v10 = vmul.f32 %v2096_v38, %v189_v6  ;;  %v1586_v38 = vunpack.c.l.bf16 %v1585_v36 }
 0x129   :  { %v1619_v36 = vunpack.c.h.bf16 %v1617_v35 }
 0x12a   :  { %v195_v9 = vrot.slane %v185_v7, %v2569_v1  ;;  %2162 = vmatprep.subr.mxu0 %v1586_v38 }
 0x12b   :  { %2163 = vmatpush3.msra.mxu0 %v1586_v38 }
 0x12c   :  { %v196_v11 = vadd.f32 %v195_v9, %v190_v8  ;;  %v197_v12 = vadd.f32 %v195_v9, %v191_v10 }
 0x12e   :  { %v198_v13 = vmax.f32 %v196_v11, 0.0  ;;  %v199_v14 = vmax.f32 %v197_v12, 0.0 }
 0x130   :  { %2129 = vmatprep.mubr.f32.mxu1 %v198_v13 }
 0x131   :  { %2130 = vmatmul.mubr.f32.vlgmr.msra.gmra.mxu1 %v199_v14  ;;  %v1863_v14 = vld [vmem:[#allocation5 + $0xf8] sm:$0xff]  }
 0x132   :  { %v1647_v15 = vunpack.c.h.bf16 %v1863_v14  ;;  %v1646_v16 = vunpack.c.l.bf16 %v1863_v14 }
 0x134   :  { %2167 = vmatprep.subr.mxu1 %v1647_v15 }
 0x135   :  { %2168 = vmatpush3.msra.mxu1 %v1647_v15 }
 0x136   :  { %2169 = vmatprep.subr.mxu1 %v1646_v16 }
 0x137   :  { %2170 = vmatpush3.msra.mxu1 %v1646_v16  ;;  %v1869_v16 = vld [vmem:[#allocation5 + $0x130] sm:$0xff]  }
 0x138   :  { %2171 = vmatprep.subr.mxu1 %v1643_v18  ;;  %v1675_v17 = vunpack.c.h.bf16 %v1869_v16 }
 0x139   :  { %2172 = vmatpush3.msra.mxu1 %v1643_v18  ;;  %v1674_v18 = vunpack.c.l.bf16 %v1869_v16 }
 0x13a   :  { %2173 = vmatprep.subr.mxu1 %v1642_v19 }
 0x13b   :  { %2174 = vmatpush3.msra.mxu1 %v1642_v19  ;;  %v1868_v19 = vld [vmem:[#allocation5 + $0x128] sm:$0xff]  }
 0x13c   :  { %2175 = vmatprep.subr.mxu1 %v1639_v21  ;;  %v1671_v20 = vunpack.c.h.bf16 %v1868_v19 }
 0x13d   :  { %2176 = vmatpush3.msra.mxu1 %v1639_v21  ;;  %v1670_v21 = vunpack.c.l.bf16 %v1868_v19 }
 0x13e   :  { %2177 = vmatprep.subr.mxu1 %v1638_v22 }
 0x13f   :  { %2178 = vmatpush3.msra.mxu1 %v1638_v22  ;;  %v1867_v22 = vld [vmem:[#allocation5 + $0x120] sm:$0xff]  }
 0x140   :  { %2179 = vmatprep.subr.mxu1 %v1635_v24  ;;  %v1667_v23 = vunpack.c.h.bf16 %v1867_v22 }
 0x141   :  { %2180 = vmatpush3.msra.mxu1 %v1635_v24  ;;  %v1666_v24 = vunpack.c.l.bf16 %v1867_v22 }
 0x142   :  { %2181 = vmatprep.subr.mxu1 %v1634_v25 }
 0x143   :  { %2182 = vmatpush3.msra.mxu1 %v1634_v25  ;;  %v1866_v25 = vld [vmem:[#allocation5 + $0x118] sm:$0xff]  }
 0x144   :  { %2183 = vmatprep.subr.mxu1 %v1631_v27  ;;  %v1663_v26 = vunpack.c.h.bf16 %v1866_v25 }
 0x145   :  { %2184 = vmatpush3.msra.mxu1 %v1631_v27  ;;  %v1662_v27 = vunpack.c.l.bf16 %v1866_v25 }
 0x146   :  { %2185 = vmatprep.subr.mxu1 %v1630_v28 }
 0x147   :  { %2186 = vmatpush3.msra.mxu1 %v1630_v28  ;;  %v1865_v28 = vld [vmem:[#allocation5 + $0x110] sm:$0xff]  }
 0x148   :  { %2187 = vmatprep.subr.mxu1 %v1627_v30  ;;  %v1659_v29 = vunpack.c.h.bf16 %v1865_v28 }
 0x149   :  { %2188 = vmatpush3.msra.mxu1 %v1627_v30  ;;  %v1658_v30 = vunpack.c.l.bf16 %v1865_v28 }
 0x14a   :  { %2189 = vmatprep.subr.mxu1 %v1626_v31 }
 0x14b   :  { %2190 = vmatpush3.msra.mxu1 %v1626_v31  ;;  %v1864_v31 = vld [vmem:[#allocation5 + $0x108] sm:$0xff]  }
 0x14c   :  { %2191 = vmatprep.subr.mxu1 %v1623_v33  ;;  %v1655_v32 = vunpack.c.h.bf16 %v1864_v31 }
 0x14d   :  { %2192 = vmatpush3.msra.mxu1 %v1623_v33  ;;  %v1654_v33 = vunpack.c.l.bf16 %v1864_v31 }
 0x14e   :  { %2193 = vmatprep.subr.mxu1 %v1622_v34 }
 0x14f   :  { %2194 = vmatpush3.msra.mxu1 %v1622_v34  ;;  %v1649_v34 = vld [vmem:[#allocation5 + $0x100] sm:$0xff]  }
 0x150   :  { %2195 = vmatprep.subr.mxu1 %v1619_v36  ;;  %v1651_v35 = vunpack.c.h.bf16 %v1649_v34 }
 0x151   :  { %2196 = vmatpush3.msra.mxu1 %v1619_v36  ;;  %v1650_v36 = vunpack.c.l.bf16 %v1649_v34 }
 0x152   :  { %2197 = vmatprep.subr.mxu1 %v1618_v37 }
 0x153   :  { %2198 = vmatpush3.msra.mxu1 %v1618_v37 }
 0x1f1   :  { %v2131_v39 = vpop.f32.mrf.mxu1 }
 0x1f2   :  { %v319_v41 = vmul.f32 %v2131_v39, %v2131_v39 }
 0x1f3   :  { %v301_v40 = vpop.f32.mrf.mxu1 }
 0x1f4   :  { %v310_v42 = vadd.f32 %v2131_v39, %v301_v40  ;;  %v318_v43 = vmul.f32 %v301_v40, %v301_v40 }
 0x1f6   :  { %v311_v44 = vrot.slane %v310_v42, 4  ;;  %v320_v45 = vadd.f32 %v319_v41, %v318_v43 }
 0x1f8   :  { %v312_v46 = vadd.f32 %v311_v44, %v310_v42  ;;  %v321_v47 = vrot.slane %v320_v45, 4 }
 0x1fa   :  { %v313_v48 = vrot.slane %v312_v46, 2  ;;  %v322_v49 = vadd.f32 %v321_v47, %v320_v45 }
 0x1fc   :  { %v314_v50 = vadd.f32 %v313_v48, %v312_v46  ;;  %v323_v51 = vrot.slane %v322_v49, 2 }
 0x1fe   :  { %v315_v52 = vrot.slane %v314_v50, 1  ;;  %v324_v53 = vadd.f32 %v323_v51, %v322_v49 }
 0x200   :  { %v316_v54 = vadd.f32 %v315_v52, %v314_v50  ;;  %v325_v55 = vrot.slane %v324_v53, 1 }
 0x202   :  { %v317_v56 = vmul.f32 0.0625, %v316_v54  ;;  %v326_v57 = vadd.f32 %v325_v55, %v324_v53 }
 0x204   :  { %v327_v58 = vmul.f32 0.0625, %v326_v57  ;;  %v328_v59 = vmul.f32 %v317_v56, %v317_v56 }
 0x206   :  { %v329_v60 = vsub.f32 %v327_v58, %v328_v59 }
 0x208   :  { %v330_v61 = vmax.f32 %v329_v60, 0.0 }
 0x20a   :  { %v331_v62 = vadd.f32 1e-05, %v330_v61 }
 0x20c   :  { %2422 = vrsqrt.f32 %v331_v62  ;;  %v383_v62 = vld [vmem:[#allocation7 + $0x2] sm:$0x1] }
 0x219   :  { %v2423_v0 = vpop.eup %2422 }
 0x21a   :  { %v333_v2 = vmul.f32 %v2423_v0, %v233_v63 }
 0x21c   :  { %v334_v4 = vmul.f32 %v333_v2, %v317_v56  ;;  %v339_v5 = vrot.slane %v333_v2, %v2569_v1  ;;  %v384_v2 = vld [vmem:[#allocation7 + $0x12] sm:$0x1] }
 0x21e   :  { %v335_v6 = vsub.f32 %v234_v3, %v334_v4  ;;  %v340_v7 = vmul.f32 %v339_v5, %v301_v40  ;;  %v341_v8 = vmul.f32 %v2131_v39, %v339_v5 }
 0x220   :  { %v345_v9 = vrot.slane %v335_v6, %v2569_v1 }
 0x222   :  { %v346_v10 = vadd.f32 %v345_v9, %v340_v7  ;;  %v347_v11 = vadd.f32 %v345_v9, %v341_v8 }
 0x224   :  { %v348_v12 = vmax.f32 %v346_v10, 0.0  ;;  %v349_v13 = vmax.f32 %v347_v11, 0.0 }
 0x226   :  { %2164 = vmatprep.mubr.f32.mxu0 %v348_v12 }
 0x227   :  { %2165 = vmatmul.mubr.f32.vlgmr.msra.gmra.mxu0 %v349_v13  ;;  %v1870_v13 = vld [vmem:[#allocation5 + $0x138] sm:$0xff]  }
 0x228   :  { %v1679_v14 = vunpack.c.h.bf16 %v1870_v13  ;;  %v1678_v15 = vunpack.c.l.bf16 %v1870_v13 }
 0x22a   :  { %2202 = vmatprep.subr.mxu0 %v1679_v14 }
 0x22b   :  { %2203 = vmatpush3.msra.mxu0 %v1679_v14 }
 0x22c   :  { %2204 = vmatprep.subr.mxu0 %v1678_v15 }
 0x22d   :  { %2205 = vmatpush3.msra.mxu0 %v1678_v15  ;;  %v1876_v15 = vld [vmem:[#allocation5 + $0x170] sm:$0xff]  }
 0x22e   :  { %2206 = vmatprep.subr.mxu0 %v1675_v17  ;;  %v1707_v16 = vunpack.c.h.bf16 %v1876_v15 }
 0x22f   :  { %2207 = vmatpush3.msra.mxu0 %v1675_v17  ;;  %v1706_v17 = vunpack.c.l.bf16 %v1876_v15 }
 0x230   :  { %2208 = vmatprep.subr.mxu0 %v1674_v18 }
 0x231   :  { %2209 = vmatpush3.msra.mxu0 %v1674_v18  ;;  %v1875_v18 = vld [vmem:[#allocation5 + $0x168] sm:$0xff]  }
 0x232   :  { %2210 = vmatprep.subr.mxu0 %v1671_v20  ;;  %v1703_v19 = vunpack.c.h.bf16 %v1875_v18 }
 0x233   :  { %2211 = vmatpush3.msra.mxu0 %v1671_v20  ;;  %v1702_v20 = vunpack.c.l.bf16 %v1875_v18 }
 0x234   :  { %2212 = vmatprep.subr.mxu0 %v1670_v21 }
 0x235   :  { %2213 = vmatpush3.msra.mxu0 %v1670_v21  ;;  %v1874_v21 = vld [vmem:[#allocation5 + $0x160] sm:$0xff]  }
 0x236   :  { %2214 = vmatprep.subr.mxu0 %v1667_v23  ;;  %v1699_v22 = vunpack.c.h.bf16 %v1874_v21 }
 0x237   :  { %2215 = vmatpush3.msra.mxu0 %v1667_v23  ;;  %v1698_v23 = vunpack.c.l.bf16 %v1874_v21 }
 0x238   :  { %2216 = vmatprep.subr.mxu0 %v1666_v24 }
 0x239   :  { %2217 = vmatpush3.msra.mxu0 %v1666_v24  ;;  %v1873_v24 = vld [vmem:[#allocation5 + $0x158] sm:$0xff]  }
 0x23a   :  { %2218 = vmatprep.subr.mxu0 %v1663_v26  ;;  %v1695_v25 = vunpack.c.h.bf16 %v1873_v24 }
 0x23b   :  { %2219 = vmatpush3.msra.mxu0 %v1663_v26  ;;  %v1694_v26 = vunpack.c.l.bf16 %v1873_v24 }
 0x23c   :  { %2220 = vmatprep.subr.mxu0 %v1662_v27 }
 0x23d   :  { %2221 = vmatpush3.msra.mxu0 %v1662_v27  ;;  %v1872_v27 = vld [vmem:[#allocation5 + $0x150] sm:$0xff]  }
 0x23e   :  { %2222 = vmatprep.subr.mxu0 %v1659_v29  ;;  %v1691_v28 = vunpack.c.h.bf16 %v1872_v27 }
 0x23f   :  { %2223 = vmatpush3.msra.mxu0 %v1659_v29  ;;  %v1690_v29 = vunpack.c.l.bf16 %v1872_v27 }
 0x240   :  { %2224 = vmatprep.subr.mxu0 %v1658_v30 }
 0x241   :  { %2225 = vmatpush3.msra.mxu0 %v1658_v30  ;;  %v1871_v30 = vld [vmem:[#allocation5 + $0x148] sm:$0xff]  }
 0x242   :  { %2226 = vmatprep.subr.mxu0 %v1655_v32  ;;  %v1687_v31 = vunpack.c.h.bf16 %v1871_v30 }
 0x243   :  { %2227 = vmatpush3.msra.mxu0 %v1655_v32  ;;  %v1686_v32 = vunpack.c.l.bf16 %v1871_v30 }
 0x244   :  { %2228 = vmatprep.subr.mxu0 %v1654_v33 }
 0x245   :  { %2229 = vmatpush3.msra.mxu0 %v1654_v33  ;;  %v1681_v33 = vld [vmem:[#allocation5 + $0x140] sm:$0xff]  }
 0x246   :  { %2230 = vmatprep.subr.mxu0 %v1651_v35  ;;  %v1683_v34 = vunpack.c.h.bf16 %v1681_v33 }
 0x247   :  { %2231 = vmatpush3.msra.mxu0 %v1651_v35  ;;  %v1682_v35 = vunpack.c.l.bf16 %v1681_v33 }
 0x248   :  { %2232 = vmatprep.subr.mxu0 %v1650_v36 }
 0x249   :  { %2233 = vmatpush3.msra.mxu0 %v1650_v36 }
 0x2e7   :  { %v2166_v38 = vpop.f32.mrf.mxu0 }
 0x2e8   :  { %v469_v40 = vmul.f32 %v2166_v38, %v2166_v38 }
 0x2e9   :  { %v451_v39 = vpop.f32.mrf.mxu0 }
 0x2ea   :  { %v460_v41 = vadd.f32 %v2166_v38, %v451_v39  ;;  %v468_v42 = vmul.f32 %v451_v39, %v451_v39 }
 0x2ec   :  { %v461_v43 = vrot.slane %v460_v41, 4  ;;  %v470_v44 = vadd.f32 %v469_v40, %v468_v42 }
 0x2ee   :  { %v462_v45 = vadd.f32 %v461_v43, %v460_v41  ;;  %v471_v46 = vrot.slane %v470_v44, 4 }
 0x2f0   :  { %v463_v47 = vrot.slane %v462_v45, 2  ;;  %v472_v48 = vadd.f32 %v471_v46, %v470_v44 }
 0x2f2   :  { %v464_v49 = vadd.f32 %v463_v47, %v462_v45  ;;  %v473_v50 = vrot.slane %v472_v48, 2 }
 0x2f4   :  { %v465_v51 = vrot.slane %v464_v49, 1  ;;  %v474_v52 = vadd.f32 %v473_v50, %v472_v48 }
 0x2f6   :  { %v466_v53 = vadd.f32 %v465_v51, %v464_v49  ;;  %v475_v54 = vrot.slane %v474_v52, 1 }
 0x2f8   :  { %v467_v55 = vmul.f32 0.0625, %v466_v53  ;;  %v476_v56 = vadd.f32 %v475_v54, %v474_v52 }
 0x2fa   :  { %v477_v57 = vmul.f32 0.0625, %v476_v56  ;;  %v478_v58 = vmul.f32 %v467_v55, %v467_v55 }
 0x2fc   :  { %v479_v59 = vsub.f32 %v477_v57, %v478_v58 }
 0x2fe   :  { %v480_v60 = vmax.f32 %v479_v59, 0.0 }
 0x300   :  { %v481_v61 = vadd.f32 1e-05, %v480_v60 }
 0x302   :  { %2424 = vrsqrt.f32 %v481_v61  ;;  %v533_v61 = vld [vmem:[#allocation7 + $0x3] sm:$0x1] }
 0x30f   :  { %v2425_v63 = vpop.eup %2424 }
 0x310   :  { %v483_v0 = vmul.f32 %v2425_v63, %v383_v62 }
 0x312   :  { %v484_v3 = vmul.f32 %v483_v0, %v467_v55  ;;  %v489_v4 = vrot.slane %v483_v0, %v2569_v1  ;;  %v534_v0 = vld [vmem:[#allocation7 + $0x13] sm:$0x1] }
 0x314   :  { %v485_v5 = vsub.f32 %v384_v2, %v484_v3  ;;  %v490_v6 = vmul.f32 %v489_v4, %v451_v39  ;;  %v491_v7 = vmul.f32 %v2166_v38, %v489_v4 }
 0x316   :  { %v495_v8 = vrot.slane %v485_v5, %v2569_v1 }
 0x318   :  { %v496_v9 = vadd.f32 %v495_v8, %v490_v6  ;;  %v497_v10 = vadd.f32 %v495_v8, %v491_v7 }
 0x31a   :  { %v498_v11 = vmax.f32 %v496_v9, 0.0  ;;  %v499_v12 = vmax.f32 %v497_v10, 0.0 }
 0x31c   :  { %2199 = vmatprep.mubr.f32.mxu1 %v498_v11 }
 0x31d   :  { %2200 = vmatmul.mubr.f32.vlgmr.msra.gmra.mxu1 %v499_v12  ;;  %v1877_v12 = vld [vmem:[#allocation5 + $0x178] sm:$0xff]  }
 0x31e   :  { %v1711_v13 = vunpack.c.h.bf16 %v1877_v12  ;;  %v1710_v14 = vunpack.c.l.bf16 %v1877_v12 }
 0x320   :  { %2237 = vmatprep.subr.mxu1 %v1711_v13 }
 0x321   :  { %2238 = vmatpush3.msra.mxu1 %v1711_v13 }
 0x322   :  { %2239 = vmatprep.subr.mxu1 %v1710_v14 }
 0x323   :  { %2240 = vmatpush3.msra.mxu1 %v1710_v14  ;;  %v1883_v14 = vld [vmem:[#allocation5 + $0x1b0] sm:$0xff]  }
 0x324   :  { %2241 = vmatprep.subr.mxu1 %v1707_v16  ;;  %v1739_v15 = vunpack.c.h.bf16 %v1883_v14 }
 0x325   :  { %2242 = vmatpush3.msra.mxu1 %v1707_v16  ;;  %v1738_v16 = vunpack.c.l.bf16 %v1883_v14 }
 0x326   :  { %2243 = vmatprep.subr.mxu1 %v1706_v17 }
 0x327   :  { %2244 = vmatpush3.msra.mxu1 %v1706_v17  ;;  %v1882_v17 = vld [vmem:[#allocation5 + $0x1a8] sm:$0xff]  }
 0x328   :  { %2245 = vmatprep.subr.mxu1 %v1703_v19  ;;  %v1735_v18 = vunpack.c.h.bf16 %v1882_v17 }
 0x329   :  { %2246 = vmatpush3.msra.mxu1 %v1703_v19  ;;  %v1734_v19 = vunpack.c.l.bf16 %v1882_v17 }
 0x32a   :  { %2247 = vmatprep.subr.mxu1 %v1702_v20 }
 0x32b   :  { %2248 = vmatpush3.msra.mxu1 %v1702_v20  ;;  %v1881_v20 = vld [vmem:[#allocation5 + $0x1a0] sm:$0xff]  }
 0x32c   :  { %2249 = vmatprep.subr.mxu1 %v1699_v22  ;;  %v1731_v21 = vunpack.c.h.bf16 %v1881_v20 }
 0x32d   :  { %2250 = vmatpush3.msra.mxu1 %v1699_v22  ;;  %v1730_v22 = vunpack.c.l.bf16 %v1881_v20 }
 0x32e   :  { %2251 = vmatprep.subr.mxu1 %v1698_v23 }
 0x32f   :  { %2252 = vmatpush3.msra.mxu1 %v1698_v23  ;;  %v1880_v23 = vld [vmem:[#allocation5 + $0x198] sm:$0xff]  }
 0x330   :  { %2253 = vmatprep.subr.mxu1 %v1695_v25  ;;  %v1727_v24 = vunpack.c.h.bf16 %v1880_v23 }
 0x331   :  { %2254 = vmatpush3.msra.mxu1 %v1695_v25  ;;  %v1726_v25 = vunpack.c.l.bf16 %v1880_v23 }
 0x332   :  { %2255 = vmatprep.subr.mxu1 %v1694_v26 }
 0x333   :  { %2256 = vmatpush3.msra.mxu1 %v1694_v26  ;;  %v1879_v26 = vld [vmem:[#allocation5 + $0x190] sm:$0xff]  }
 0x334   :  { %2257 = vmatprep.subr.mxu1 %v1691_v28  ;;  %v1723_v27 = vunpack.c.h.bf16 %v1879_v26 }
 0x335   :  { %2258 = vmatpush3.msra.mxu1 %v1691_v28  ;;  %v1722_v28 = vunpack.c.l.bf16 %v1879_v26 }
 0x336   :  { %2259 = vmatprep.subr.mxu1 %v1690_v29 }
 0x337   :  { %2260 = vmatpush3.msra.mxu1 %v1690_v29  ;;  %v1878_v29 = vld [vmem:[#allocation5 + $0x188] sm:$0xff]  }
 0x338   :  { %2261 = vmatprep.subr.mxu1 %v1687_v31  ;;  %v1719_v30 = vunpack.c.h.bf16 %v1878_v29 }
 0x339   :  { %2262 = vmatpush3.msra.mxu1 %v1687_v31  ;;  %v1718_v31 = vunpack.c.l.bf16 %v1878_v29 }
 0x33a   :  { %2263 = vmatprep.subr.mxu1 %v1686_v32 }
 0x33b   :  { %2264 = vmatpush3.msra.mxu1 %v1686_v32  ;;  %v1713_v32 = vld [vmem:[#allocation5 + $0x180] sm:$0xff]  }
 0x33c   :  { %2265 = vmatprep.subr.mxu1 %v1683_v34  ;;  %v1715_v33 = vunpack.c.h.bf16 %v1713_v32 }
 0x33d   :  { %2266 = vmatpush3.msra.mxu1 %v1683_v34  ;;  %v1714_v34 = vunpack.c.l.bf16 %v1713_v32 }
 0x33e   :  { %2267 = vmatprep.subr.mxu1 %v1682_v35 }
 0x33f   :  { %2268 = vmatpush3.msra.mxu1 %v1682_v35 }
 0x3dd   :  { %v2201_v37 = vpop.f32.mrf.mxu1 }
 0x3de   :  { %v619_v39 = vmul.f32 %v2201_v37, %v2201_v37 }
 0x3df   :  { %v601_v38 = vpop.f32.mrf.mxu1 }
 0x3e0   :  { %v610_v40 = vadd.f32 %v2201_v37, %v601_v38  ;;  %v618_v41 = vmul.f32 %v601_v38, %v601_v38 }
 0x3e2   :  { %v611_v42 = vrot.slane %v610_v40, 4  ;;  %v620_v43 = vadd.f32 %v619_v39, %v618_v41 }
 0x3e4   :  { %v612_v44 = vadd.f32 %v611_v42, %v610_v40  ;;  %v621_v45 = vrot.slane %v620_v43, 4 }
 0x3e6   :  { %v613_v46 = vrot.slane %v612_v44, 2  ;;  %v622_v47 = vadd.f32 %v621_v45, %v620_v43 }
 0x3e8   :  { %v614_v48 = vadd.f32 %v613_v46, %v612_v44  ;;  %v623_v49 = vrot.slane %v622_v47, 2 }
 0x3ea   :  { %v615_v50 = vrot.slane %v614_v48, 1  ;;  %v624_v51 = vadd.f32 %v623_v49, %v622_v47 }
 0x3ec   :  { %v616_v52 = vadd.f32 %v615_v50, %v614_v48  ;;  %v625_v53 = vrot.slane %v624_v51, 1 }
 0x3ee   :  { %v617_v54 = vmul.f32 0.0625, %v616_v52  ;;  %v626_v55 = vadd.f32 %v625_v53, %v624_v51 }
 0x3f0   :  { %v627_v56 = vmul.f32 0.0625, %v626_v55  ;;  %v628_v57 = vmul.f32 %v617_v54, %v617_v54 }
 0x3f2   :  { %v629_v58 = vsub.f32 %v627_v56, %v628_v57 }
 0x3f4   :  { %v630_v59 = vmax.f32 %v629_v58, 0.0 }
 0x3f6   :  { %v631_v60 = vadd.f32 1e-05, %v630_v59 }
 0x3f8   :  { %2426 = vrsqrt.f32 %v631_v60  ;;  %v683_v60 = vld [vmem:[#allocation7 + $0x4] sm:$0x1] }
 0x405   :  { %v2427_v62 = vpop.eup %2426 }
 0x406   :  { %v633_v63 = vmul.f32 %v2427_v62, %v533_v61 }
 0x408   :  { %v634_v2 = vmul.f32 %v633_v63, %v617_v54  ;;  %v639_v3 = vrot.slane %v633_v63, %v2569_v1  ;;  %v684_v63 = vld [vmem:[#allocation7 + $0x14] sm:$0x1] }
 0x40a   :  { %v635_v4 = vsub.f32 %v534_v0, %v634_v2  ;;  %v640_v5 = vmul.f32 %v639_v3, %v601_v38  ;;  %v641_v6 = vmul.f32 %v2201_v37, %v639_v3 }
 0x40c   :  { %v645_v7 = vrot.slane %v635_v4, %v2569_v1 }
 0x40e   :  { %v646_v8 = vadd.f32 %v645_v7, %v640_v5  ;;  %v647_v9 = vadd.f32 %v645_v7, %v641_v6 }
 0x410   :  { %v648_v10 = vmax.f32 %v646_v8, 0.0  ;;  %v649_v11 = vmax.f32 %v647_v9, 0.0 }
 0x412   :  { %2234 = vmatprep.mubr.f32.mxu0 %v648_v10 }
 0x413   :  { %2235 = vmatmul.mubr.f32.vlgmr.msra.gmra.mxu0 %v649_v11  ;;  %v1884_v11 = vld [vmem:[#allocation5 + $0x1b8] sm:$0xff]  }
 0x414   :  { %v1743_v12 = vunpack.c.h.bf16 %v1884_v11  ;;  %v1742_v13 = vunpack.c.l.bf16 %v1884_v11 }
 0x416   :  { %2272 = vmatprep.subr.mxu0 %v1743_v12 }
 0x417   :  { %2273 = vmatpush3.msra.mxu0 %v1743_v12 }
 0x418   :  { %2274 = vmatprep.subr.mxu0 %v1742_v13 }
 0x419   :  { %2275 = vmatpush3.msra.mxu0 %v1742_v13  ;;  %v1890_v13 = vld [vmem:[#allocation5 + $0x1f0] sm:$0xff]  }
 0x41a   :  { %2276 = vmatprep.subr.mxu0 %v1739_v15  ;;  %v1771_v14 = vunpack.c.h.bf16 %v1890_v13 }
 0x41b   :  { %2277 = vmatpush3.msra.mxu0 %v1739_v15  ;;  %v1770_v15 = vunpack.c.l.bf16 %v1890_v13 }
 0x41c   :  { %2278 = vmatprep.subr.mxu0 %v1738_v16 }
 0x41d   :  { %2279 = vmatpush3.msra.mxu0 %v1738_v16  ;;  %v1889_v16 = vld [vmem:[#allocation5 + $0x1e8] sm:$0xff]  }
 0x41e   :  { %2280 = vmatprep.subr.mxu0 %v1735_v18  ;;  %v1767_v17 = vunpack.c.h.bf16 %v1889_v16 }
 0x41f   :  { %2281 = vmatpush3.msra.mxu0 %v1735_v18  ;;  %v1766_v18 = vunpack.c.l.bf16 %v1889_v16 }
 0x420   :  { %2282 = vmatprep.subr.mxu0 %v1734_v19 }
 0x421   :  { %2283 = vmatpush3.msra.mxu0 %v1734_v19  ;;  %v1888_v19 = vld [vmem:[#allocation5 + $0x1e0] sm:$0xff]  }
 0x422   :  { %2284 = vmatprep.subr.mxu0 %v1731_v21  ;;  %v1763_v20 = vunpack.c.h.bf16 %v1888_v19 }
 0x423   :  { %2285 = vmatpush3.msra.mxu0 %v1731_v21  ;;  %v1762_v21 = vunpack.c.l.bf16 %v1888_v19 }
 0x424   :  { %2286 = vmatprep.subr.mxu0 %v1730_v22 }
 0x425   :  { %2287 = vmatpush3.msra.mxu0 %v1730_v22  ;;  %v1887_v22 = vld [vmem:[#allocation5 + $0x1d8] sm:$0xff]  }
 0x426   :  { %2288 = vmatprep.subr.mxu0 %v1727_v24  ;;  %v1759_v23 = vunpack.c.h.bf16 %v1887_v22 }
 0x427   :  { %2289 = vmatpush3.msra.mxu0 %v1727_v24  ;;  %v1758_v24 = vunpack.c.l.bf16 %v1887_v22 }
 0x428   :  { %2290 = vmatprep.subr.mxu0 %v1726_v25 }
 0x429   :  { %2291 = vmatpush3.msra.mxu0 %v1726_v25  ;;  %v1886_v25 = vld [vmem:[#allocation5 + $0x1d0] sm:$0xff]  }
 0x42a   :  { %2292 = vmatprep.subr.mxu0 %v1723_v27  ;;  %v1755_v26 = vunpack.c.h.bf16 %v1886_v25 }
 0x42b   :  { %2293 = vmatpush3.msra.mxu0 %v1723_v27  ;;  %v1754_v27 = vunpack.c.l.bf16 %v1886_v25 }
 0x42c   :  { %2294 = vmatprep.subr.mxu0 %v1722_v28 }
 0x42d   :  { %2295 = vmatpush3.msra.mxu0 %v1722_v28  ;;  %v1885_v28 = vld [vmem:[#allocation5 + $0x1c8] sm:$0xff]  }
 0x42e   :  { %2296 = vmatprep.subr.mxu0 %v1719_v30  ;;  %v1751_v29 = vunpack.c.h.bf16 %v1885_v28 }
 0x42f   :  { %2297 = vmatpush3.msra.mxu0 %v1719_v30  ;;  %v1750_v30 = vunpack.c.l.bf16 %v1885_v28 }
 0x430   :  { %2298 = vmatprep.subr.mxu0 %v1718_v31 }
 0x431   :  { %2299 = vmatpush3.msra.mxu0 %v1718_v31  ;;  %v1745_v31 = vld [vmem:[#allocation5 + $0x1c0] sm:$0xff]  }
 0x432   :  { %2300 = vmatprep.subr.mxu0 %v1715_v33  ;;  %v1747_v32 = vunpack.c.h.bf16 %v1745_v31 }
 0x433   :  { %2301 = vmatpush3.msra.mxu0 %v1715_v33  ;;  %v1746_v33 = vunpack.c.l.bf16 %v1745_v31 }
 0x434   :  { %2302 = vmatprep.subr.mxu0 %v1714_v34 }
 0x435   :  { %2303 = vmatpush3.msra.mxu0 %v1714_v34 }
 0x4d3   :  { %v2236_v36 = vpop.f32.mrf.mxu0 }
 0x4d4   :  { %v769_v38 = vmul.f32 %v2236_v36, %v2236_v36 }
 0x4d5   :  { %v751_v37 = vpop.f32.mrf.mxu0 }
 0x4d6   :  { %v760_v39 = vadd.f32 %v2236_v36, %v751_v37  ;;  %v768_v40 = vmul.f32 %v751_v37, %v751_v37 }
 0x4d8   :  { %v761_v41 = vrot.slane %v760_v39, 4  ;;  %v770_v42 = vadd.f32 %v769_v38, %v768_v40 }
 0x4da   :  { %v762_v43 = vadd.f32 %v761_v41, %v760_v39  ;;  %v771_v44 = vrot.slane %v770_v42, 4 }
 0x4dc   :  { %v763_v45 = vrot.slane %v762_v43, 2  ;;  %v772_v46 = vadd.f32 %v771_v44, %v770_v42 }
 0x4de   :  { %v764_v47 = vadd.f32 %v763_v45, %v762_v43  ;;  %v773_v48 = vrot.slane %v772_v46, 2 }
 0x4e0   :  { %v765_v49 = vrot.slane %v764_v47, 1  ;;  %v774_v50 = vadd.f32 %v773_v48, %v772_v46 }
 0x4e2   :  { %v766_v51 = vadd.f32 %v765_v49, %v764_v47  ;;  %v775_v52 = vrot.slane %v774_v50, 1 }
 0x4e4   :  { %v767_v53 = vmul.f32 0.0625, %v766_v51  ;;  %v776_v54 = vadd.f32 %v775_v52, %v774_v50 }
 0x4e6   :  { %v777_v55 = vmul.f32 0.0625, %v776_v54  ;;  %v778_v56 = vmul.f32 %v767_v53, %v767_v53 }
 0x4e8   :  { %v779_v57 = vsub.f32 %v777_v55, %v778_v56 }
 0x4ea   :  { %v780_v58 = vmax.f32 %v779_v57, 0.0 }
 0x4ec   :  { %v781_v59 = vadd.f32 1e-05, %v780_v58 }
 0x4ee   :  { %2428 = vrsqrt.f32 %v781_v59  ;;  %v833_v59 = vld [vmem:[#allocation7 + $0x5] sm:$0x1] }
 0x4fb   :  { %v2429_v61 = vpop.eup %2428 }
 0x4fc   :  { %v783_v62 = vmul.f32 %v2429_v61, %v683_v60 }
 0x4fe   :  { %v784_v0 = vmul.f32 %v783_v62, %v767_v53  ;;  %v789_v2 = vrot.slane %v783_v62, %v2569_v1  ;;  %v834_v62 = vld [vmem:[#allocation7 + $0x15] sm:$0x1] }
 0x500   :  { %v785_v3 = vsub.f32 %v684_v63, %v784_v0  ;;  %v790_v4 = vmul.f32 %v789_v2, %v751_v37  ;;  %v791_v5 = vmul.f32 %v2236_v36, %v789_v2 }
 0x502   :  { %v795_v6 = vrot.slane %v785_v3, %v2569_v1 }
 0x504   :  { %v796_v7 = vadd.f32 %v795_v6, %v790_v4  ;;  %v797_v8 = vadd.f32 %v795_v6, %v791_v5 }
 0x506   :  { %v798_v9 = vmax.f32 %v796_v7, 0.0  ;;  %v799_v10 = vmax.f32 %v797_v8, 0.0 }
 0x508   :  { %2269 = vmatprep.mubr.f32.mxu1 %v798_v9 }
 0x509   :  { %2270 = vmatmul.mubr.f32.vlgmr.msra.gmra.mxu1 %v799_v10  ;;  %v1891_v10 = vld [vmem:[#allocation5 + $0x1f8] sm:$0xff]  }
 0x50a   :  { %v1775_v11 = vunpack.c.h.bf16 %v1891_v10  ;;  %v1774_v12 = vunpack.c.l.bf16 %v1891_v10 }
 0x50c   :  { %2307 = vmatprep.subr.mxu1 %v1775_v11 }
 0x50d   :  { %2308 = vmatpush3.msra.mxu1 %v1775_v11 }
 0x50e   :  { %2309 = vmatprep.subr.mxu1 %v1774_v12 }
 0x50f   :  { %2310 = vmatpush3.msra.mxu1 %v1774_v12  ;;  %v1897_v12 = vld [vmem:[#allocation5 + $0x230] sm:$0xff]  }
 0x510   :  { %2311 = vmatprep.subr.mxu1 %v1771_v14  ;;  %v1803_v13 = vunpack.c.h.bf16 %v1897_v12 }
 0x511   :  { %2312 = vmatpush3.msra.mxu1 %v1771_v14  ;;  %v1802_v14 = vunpack.c.l.bf16 %v1897_v12 }
 0x512   :  { %2313 = vmatprep.subr.mxu1 %v1770_v15 }
 0x513   :  { %2314 = vmatpush3.msra.mxu1 %v1770_v15  ;;  %v1896_v15 = vld [vmem:[#allocation5 + $0x228] sm:$0xff]  }
 0x514   :  { %2315 = vmatprep.subr.mxu1 %v1767_v17  ;;  %v1799_v16 = vunpack.c.h.bf16 %v1896_v15 }
 0x515   :  { %2316 = vmatpush3.msra.mxu1 %v1767_v17  ;;  %v1798_v17 = vunpack.c.l.bf16 %v1896_v15 }
 0x516   :  { %2317 = vmatprep.subr.mxu1 %v1766_v18 }
 0x517   :  { %2318 = vmatpush3.msra.mxu1 %v1766_v18  ;;  %v1895_v18 = vld [vmem:[#allocation5 + $0x220] sm:$0xff]  }
 0x518   :  { %2319 = vmatprep.subr.mxu1 %v1763_v20  ;;  %v1795_v19 = vunpack.c.h.bf16 %v1895_v18 }
 0x519   :  { %2320 = vmatpush3.msra.mxu1 %v1763_v20  ;;  %v1794_v20 = vunpack.c.l.bf16 %v1895_v18 }
 0x51a   :  { %2321 = vmatprep.subr.mxu1 %v1762_v21 }
 0x51b   :  { %2322 = vmatpush3.msra.mxu1 %v1762_v21  ;;  %v1894_v21 = vld [vmem:[#allocation5 + $0x218] sm:$0xff]  }
 0x51c   :  { %2323 = vmatprep.subr.mxu1 %v1759_v23  ;;  %v1791_v22 = vunpack.c.h.bf16 %v1894_v21 }
 0x51d   :  { %2324 = vmatpush3.msra.mxu1 %v1759_v23  ;;  %v1790_v23 = vunpack.c.l.bf16 %v1894_v21 }
 0x51e   :  { %2325 = vmatprep.subr.mxu1 %v1758_v24 }
 0x51f   :  { %2326 = vmatpush3.msra.mxu1 %v1758_v24  ;;  %v1893_v24 = vld [vmem:[#allocation5 + $0x210] sm:$0xff]  }
 0x520   :  { %2327 = vmatprep.subr.mxu1 %v1755_v26  ;;  %v1787_v25 = vunpack.c.h.bf16 %v1893_v24 }
 0x521   :  { %2328 = vmatpush3.msra.mxu1 %v1755_v26  ;;  %v1786_v26 = vunpack.c.l.bf16 %v1893_v24 }
 0x522   :  { %2329 = vmatprep.subr.mxu1 %v1754_v27 }
 0x523   :  { %2330 = vmatpush3.msra.mxu1 %v1754_v27  ;;  %v1892_v27 = vld [vmem:[#allocation5 + $0x208] sm:$0xff]  }
 0x524   :  { %2331 = vmatprep.subr.mxu1 %v1751_v29  ;;  %v1783_v28 = vunpack.c.h.bf16 %v1892_v27 }
 0x525   :  { %2332 = vmatpush3.msra.mxu1 %v1751_v29  ;;  %v1782_v29 = vunpack.c.l.bf16 %v1892_v27 }
 0x526   :  { %2333 = vmatprep.subr.mxu1 %v1750_v30 }
 0x527   :  { %2334 = vmatpush3.msra.mxu1 %v1750_v30  ;;  %v1777_v30 = vld [vmem:[#allocation5 + $0x200] sm:$0xff]  }
 0x528   :  { %2335 = vmatprep.subr.mxu1 %v1747_v32  ;;  %v1779_v31 = vunpack.c.h.bf16 %v1777_v30 }
 0x529   :  { %2336 = vmatpush3.msra.mxu1 %v1747_v32  ;;  %v1778_v32 = vunpack.c.l.bf16 %v1777_v30 }
 0x52a   :  { %2337 = vmatprep.subr.mxu1 %v1746_v33 }
 0x52b   :  { %2338 = vmatpush3.msra.mxu1 %v1746_v33 }
 0x5c9   :  { %v2271_v35 = vpop.f32.mrf.mxu1 }
 0x5ca   :  { %v919_v37 = vmul.f32 %v2271_v35, %v2271_v35 }
 0x5cb   :  { %v901_v36 = vpop.f32.mrf.mxu1 }
 0x5cc   :  { %v910_v38 = vadd.f32 %v2271_v35, %v901_v36  ;;  %v918_v39 = vmul.f32 %v901_v36, %v901_v36 }
 0x5ce   :  { %v911_v40 = vrot.slane %v910_v38, 4  ;;  %v920_v41 = vadd.f32 %v919_v37, %v918_v39 }
 0x5d0   :  { %v912_v42 = vadd.f32 %v911_v40, %v910_v38  ;;  %v921_v43 = vrot.slane %v920_v41, 4 }
 0x5d2   :  { %v913_v44 = vrot.slane %v912_v42, 2  ;;  %v922_v45 = vadd.f32 %v921_v43, %v920_v41 }
 0x5d4   :  { %v914_v46 = vadd.f32 %v913_v44, %v912_v42  ;;  %v923_v47 = vrot.slane %v922_v45, 2 }
 0x5d6   :  { %v915_v48 = vrot.slane %v914_v46, 1  ;;  %v924_v49 = vadd.f32 %v923_v47, %v922_v45 }
 0x5d8   :  { %v916_v50 = vadd.f32 %v915_v48, %v914_v46  ;;  %v925_v51 = vrot.slane %v924_v49, 1 }
 0x5da   :  { %v917_v52 = vmul.f32 0.0625, %v916_v50  ;;  %v926_v53 = vadd.f32 %v925_v51, %v924_v49 }
 0x5dc   :  { %v927_v54 = vmul.f32 0.0625, %v926_v53  ;;  %v928_v55 = vmul.f32 %v917_v52, %v917_v52 }
 0x5de   :  { %v929_v56 = vsub.f32 %v927_v54, %v928_v55 }
 0x5e0   :  { %v930_v57 = vmax.f32 %v929_v56, 0.0 }
 0x5e2   :  { %v931_v58 = vadd.f32 1e-05, %v930_v57 }
 0x5e4   :  { %2430 = vrsqrt.f32 %v931_v58  ;;  %v983_v58 = vld [vmem:[#allocation7 + $0x6] sm:$0x1] }
 0x5f1   :  { %v2431_v60 = vpop.eup %2430 }
 0x5f2   :  { %v933_v61 = vmul.f32 %v2431_v60, %v833_v59 }
 0x5f4   :  { %v934_v63 = vmul.f32 %v933_v61, %v917_v52  ;;  %v939_v0 = vrot.slane %v933_v61, %v2569_v1  ;;  %v984_v61 = vld [vmem:[#allocation7 + $0x16] sm:$0x1] }
 0x5f6   :  { %v935_v2 = vsub.f32 %v834_v62, %v934_v63  ;;  %v940_v3 = vmul.f32 %v939_v0, %v901_v36  ;;  %v941_v4 = vmul.f32 %v2271_v35, %v939_v0 }
 0x5f8   :  { %v945_v5 = vrot.slane %v935_v2, %v2569_v1 }
 0x5fa   :  { %v946_v6 = vadd.f32 %v945_v5, %v940_v3  ;;  %v947_v7 = vadd.f32 %v945_v5, %v941_v4 }
 0x5fc   :  { %v948_v8 = vmax.f32 %v946_v6, 0.0  ;;  %v949_v9 = vmax.f32 %v947_v7, 0.0 }
 0x5fe   :  { %2304 = vmatprep.mubr.f32.mxu0 %v948_v8 }
 0x5ff   :  { %2305 = vmatmul.mubr.f32.vlgmr.msra.gmra.mxu0 %v949_v9  ;;  %v1898_v9 = vld [vmem:[#allocation5 + $0x238] sm:$0xff]  }
 0x600   :  { %v1807_v10 = vunpack.c.h.bf16 %v1898_v9  ;;  %v1806_v11 = vunpack.c.l.bf16 %v1898_v9 }
 0x602   :  { %2342 = vmatprep.subr.mxu0 %v1807_v10 }
 0x603   :  { %2343 = vmatpush3.msra.mxu0 %v1807_v10 }
 0x604   :  { %2344 = vmatprep.subr.mxu0 %v1806_v11 }
 0x605   :  { %2345 = vmatpush3.msra.mxu0 %v1806_v11  ;;  %v1904_v11 = vld [vmem:[#allocation5 + $0x270] sm:$0xff]  }
 0x606   :  { %2346 = vmatprep.subr.mxu0 %v1803_v13  ;;  %v1835_v12 = vunpack.c.h.bf16 %v1904_v11 }
 0x607   :  { %2347 = vmatpush3.msra.mxu0 %v1803_v13  ;;  %v1834_v13 = vunpack.c.l.bf16 %v1904_v11 }
 0x608   :  { %2348 = vmatprep.subr.mxu0 %v1802_v14 }
 0x609   :  { %2349 = vmatpush3.msra.mxu0 %v1802_v14  ;;  %v1903_v14 = vld [vmem:[#allocation5 + $0x268] sm:$0xff]  }
 0x60a   :  { %2350 = vmatprep.subr.mxu0 %v1799_v16  ;;  %v1831_v15 = vunpack.c.h.bf16 %v1903_v14 }
 0x60b   :  { %2351 = vmatpush3.msra.mxu0 %v1799_v16  ;;  %v1830_v16 = vunpack.c.l.bf16 %v1903_v14 }
 0x60c   :  { %2352 = vmatprep.subr.mxu0 %v1798_v17 }
 0x60d   :  { %2353 = vmatpush3.msra.mxu0 %v1798_v17  ;;  %v1902_v17 = vld [vmem:[#allocation5 + $0x260] sm:$0xff]  }
 0x60e   :  { %2354 = vmatprep.subr.mxu0 %v1795_v19  ;;  %v1827_v18 = vunpack.c.h.bf16 %v1902_v17 }
 0x60f   :  { %2355 = vmatpush3.msra.mxu0 %v1795_v19  ;;  %v1826_v19 = vunpack.c.l.bf16 %v1902_v17 }
 0x610   :  { %2356 = vmatprep.subr.mxu0 %v1794_v20 }
 0x611   :  { %2357 = vmatpush3.msra.mxu0 %v1794_v20  ;;  %v1901_v20 = vld [vmem:[#allocation5 + $0x258] sm:$0xff]  }
 0x612   :  { %2358 = vmatprep.subr.mxu0 %v1791_v22  ;;  %v1823_v21 = vunpack.c.h.bf16 %v1901_v20 }
 0x613   :  { %2359 = vmatpush3.msra.mxu0 %v1791_v22  ;;  %v1822_v22 = vunpack.c.l.bf16 %v1901_v20 }
 0x614   :  { %2360 = vmatprep.subr.mxu0 %v1790_v23 }
 0x615   :  { %2361 = vmatpush3.msra.mxu0 %v1790_v23  ;;  %v1900_v23 = vld [vmem:[#allocation5 + $0x250] sm:$0xff]  }
 0x616   :  { %2362 = vmatprep.subr.mxu0 %v1787_v25  ;;  %v1819_v24 = vunpack.c.h.bf16 %v1900_v23 }
 0x617   :  { %2363 = vmatpush3.msra.mxu0 %v1787_v25  ;;  %v1818_v25 = vunpack.c.l.bf16 %v1900_v23 }
 0x618   :  { %2364 = vmatprep.subr.mxu0 %v1786_v26 }
 0x619   :  { %2365 = vmatpush3.msra.mxu0 %v1786_v26  ;;  %v1899_v26 = vld [vmem:[#allocation5 + $0x248] sm:$0xff]  }
 0x61a   :  { %2366 = vmatprep.subr.mxu0 %v1783_v28  ;;  %v1815_v27 = vunpack.c.h.bf16 %v1899_v26 }
 0x61b   :  { %2367 = vmatpush3.msra.mxu0 %v1783_v28  ;;  %v1814_v28 = vunpack.c.l.bf16 %v1899_v26 }
 0x61c   :  { %2368 = vmatprep.subr.mxu0 %v1782_v29 }
 0x61d   :  { %2369 = vmatpush3.msra.mxu0 %v1782_v29  ;;  %v1809_v29 = vld [vmem:[#allocation5 + $0x240] sm:$0xff]  }
 0x61e   :  { %2370 = vmatprep.subr.mxu0 %v1779_v31  ;;  %v1811_v30 = vunpack.c.h.bf16 %v1809_v29 }
 0x61f   :  { %2371 = vmatpush3.msra.mxu0 %v1779_v31  ;;  %v1810_v31 = vunpack.c.l.bf16 %v1809_v29 }
 0x620   :  { %2372 = vmatprep.subr.mxu0 %v1778_v32 }
 0x621   :  { %2373 = vmatpush3.msra.mxu0 %v1778_v32 }
 0x6bf   :  { %v2306_v34 = vpop.f32.mrf.mxu0 }
 0x6c0   :  { %v1069_v36 = vmul.f32 %v2306_v34, %v2306_v34 }
 0x6c1   :  { %v1051_v35 = vpop.f32.mrf.mxu0 }
 0x6c2   :  { %v1060_v37 = vadd.f32 %v2306_v34, %v1051_v35  ;;  %v1068_v38 = vmul.f32 %v1051_v35, %v1051_v35 }
 0x6c4   :  { %v1061_v39 = vrot.slane %v1060_v37, 4  ;;  %v1070_v40 = vadd.f32 %v1069_v36, %v1068_v38 }
 0x6c6   :  { %v1062_v41 = vadd.f32 %v1061_v39, %v1060_v37  ;;  %v1071_v42 = vrot.slane %v1070_v40, 4 }
 0x6c8   :  { %v1063_v43 = vrot.slane %v1062_v41, 2  ;;  %v1072_v44 = vadd.f32 %v1071_v42, %v1070_v40 }
 0x6ca   :  { %v1064_v45 = vadd.f32 %v1063_v43, %v1062_v41  ;;  %v1073_v46 = vrot.slane %v1072_v44, 2 }
 0x6cc   :  { %v1065_v47 = vrot.slane %v1064_v45, 1  ;;  %v1074_v48 = vadd.f32 %v1073_v46, %v1072_v44 }
 0x6ce   :  { %v1066_v49 = vadd.f32 %v1065_v47, %v1064_v45  ;;  %v1075_v50 = vrot.slane %v1074_v48, 1 }
 0x6d0   :  { %v1067_v51 = vmul.f32 0.0625, %v1066_v49  ;;  %v1076_v52 = vadd.f32 %v1075_v50, %v1074_v48 }
 0x6d2   :  { %v1077_v53 = vmul.f32 0.0625, %v1076_v52  ;;  %v1078_v54 = vmul.f32 %v1067_v51, %v1067_v51 }
 0x6d4   :  { %v1079_v55 = vsub.f32 %v1077_v53, %v1078_v54 }
 0x6d6   :  { %v1080_v56 = vmax.f32 %v1079_v55, 0.0 }
 0x6d8   :  { %v1081_v57 = vadd.f32 1e-05, %v1080_v56 }
 0x6da   :  { %2432 = vrsqrt.f32 %v1081_v57  ;;  %v1133_v57 = vld [vmem:[#allocation7 + $0x7] sm:$0x1] }
 0x6e7   :  { %v2433_v59 = vpop.eup %2432 }
 0x6e8   :  { %v1083_v60 = vmul.f32 %v2433_v59, %v983_v58 }
 0x6ea   :  { %v1084_v62 = vmul.f32 %v1083_v60, %v1067_v51  ;;  %v1089_v63 = vrot.slane %v1083_v60, %v2569_v1  ;;  %v1134_v60 = vld [vmem:[#allocation7 + $0x17] sm:$0x1] }
 0x6ec   :  { %v1085_v0 = vsub.f32 %v984_v61, %v1084_v62  ;;  %v1090_v2 = vmul.f32 %v1089_v63, %v1051_v35  ;;  %v1091_v3 = vmul.f32 %v2306_v34, %v1089_v63 }
 0x6ee   :  { %v1095_v4 = vrot.slane %v1085_v0, %v2569_v1 }
 0x6f0   :  { %v1096_v5 = vadd.f32 %v1095_v4, %v1090_v2  ;;  %v1097_v6 = vadd.f32 %v1095_v4, %v1091_v3 }
 0x6f2   :  { %v1098_v7 = vmax.f32 %v1096_v5, 0.0  ;;  %v1099_v8 = vmax.f32 %v1097_v6, 0.0 }
 0x6f4   :  { %2339 = vmatprep.mubr.f32.mxu1 %v1098_v7 }
 0x6f5   :  { %2340 = vmatmul.mubr.f32.vlgmr.msra.gmra.mxu1 %v1099_v8  ;;  %v1905_v8 = vld [vmem:[#allocation5 + $0x278] sm:$0xff]  }
 0x6f6   :  { %v1839_v9 = vunpack.c.h.bf16 %v1905_v8  ;;  %v1838_v10 = vunpack.c.l.bf16 %v1905_v8 }
 0x6f8   :  { %2377 = vmatprep.subr.mxu1 %v1839_v9 }
 0x6f9   :  { %2378 = vmatpush3.msra.mxu1 %v1839_v9 }
 0x6fa   :  { %2379 = vmatprep.subr.mxu1 %v1838_v10 }
 0x6fb   :  { %2380 = vmatpush3.msra.mxu1 %v1838_v10 }
 0x6fc   :  { %2381 = vmatprep.subr.mxu1 %v1835_v12 }
 0x6fd   :  { %2382 = vmatpush3.msra.mxu1 %v1835_v12 }
 0x6fe   :  { %2383 = vmatprep.subr.mxu1 %v1834_v13 }
 0x6ff   :  { %2384 = vmatpush3.msra.mxu1 %v1834_v13 }
 0x700   :  { %2385 = vmatprep.subr.mxu1 %v1831_v15 }
 0x701   :  { %2386 = vmatpush3.msra.mxu1 %v1831_v15 }
 0x702   :  { %2387 = vmatprep.subr.mxu1 %v1830_v16 }
 0x703   :  { %2388 = vmatpush3.msra.mxu1 %v1830_v16 }
 0x704   :  { %2389 = vmatprep.subr.mxu1 %v1827_v18 }
 0x705   :  { %2390 = vmatpush3.msra.mxu1 %v1827_v18 }
 0x706   :  { %2391 = vmatprep.subr.mxu1 %v1826_v19 }
 0x707   :  { %2392 = vmatpush3.msra.mxu1 %v1826_v19 }
 0x708   :  { %2393 = vmatprep.subr.mxu1 %v1823_v21 }
 0x709   :  { %2394 = vmatpush3.msra.mxu1 %v1823_v21 }
 0x70a   :  { %2395 = vmatprep.subr.mxu1 %v1822_v22 }
 0x70b   :  { %2396 = vmatpush3.msra.mxu1 %v1822_v22 }
 0x70c   :  { %2397 = vmatprep.subr.mxu1 %v1819_v24 }
 0x70d   :  { %2398 = vmatpush3.msra.mxu1 %v1819_v24 }
 0x70e   :  { %2399 = vmatprep.subr.mxu1 %v1818_v25 }
 0x70f   :  { %2400 = vmatpush3.msra.mxu1 %v1818_v25 }
 0x710   :  { %2401 = vmatprep.subr.mxu1 %v1815_v27 }
 0x711   :  { %2402 = vmatpush3.msra.mxu1 %v1815_v27 }
 0x712   :  { %2403 = vmatprep.subr.mxu1 %v1814_v28 }
 0x713   :  { %2404 = vmatpush3.msra.mxu1 %v1814_v28 }
 0x714   :  { %2405 = vmatprep.subr.mxu1 %v1811_v30 }
 0x715   :  { %2406 = vmatpush3.msra.mxu1 %v1811_v30 }
 0x716   :  { %2407 = vmatprep.subr.mxu1 %v1810_v31 }
 0x717   :  { %2408 = vmatpush3.msra.mxu1 %v1810_v31 }
 0x7b5   :  { %v2341_v33 = vpop.f32.mrf.mxu1 }
 0x7b6   :  { %v1219_v35 = vmul.f32 %v2341_v33, %v2341_v33 }
 0x7b7   :  { %v1201_v34 = vpop.f32.mrf.mxu1 }
 0x7b8   :  { %v1210_v36 = vadd.f32 %v2341_v33, %v1201_v34  ;;  %v1218_v37 = vmul.f32 %v1201_v34, %v1201_v34 }
 0x7ba   :  { %v1211_v38 = vrot.slane %v1210_v36, 4  ;;  %v1220_v39 = vadd.f32 %v1219_v35, %v1218_v37 }
 0x7bc   :  { %v1212_v40 = vadd.f32 %v1211_v38, %v1210_v36  ;;  %v1221_v41 = vrot.slane %v1220_v39, 4 }
 0x7be   :  { %v1213_v42 = vrot.slane %v1212_v40, 2  ;;  %v1222_v43 = vadd.f32 %v1221_v41, %v1220_v39 }
 0x7c0   :  { %v1214_v44 = vadd.f32 %v1213_v42, %v1212_v40  ;;  %v1223_v45 = vrot.slane %v1222_v43, 2 }
 0x7c2   :  { %v1215_v46 = vrot.slane %v1214_v44, 1  ;;  %v1224_v47 = vadd.f32 %v1223_v45, %v1222_v43 }
 0x7c4   :  { %v1216_v48 = vadd.f32 %v1215_v46, %v1214_v44  ;;  %v1225_v49 = vrot.slane %v1224_v47, 1 }
 0x7c6   :  { %v1217_v50 = vmul.f32 0.0625, %v1216_v48  ;;  %v1226_v51 = vadd.f32 %v1225_v49, %v1224_v47 }
 0x7c8   :  { %v1227_v52 = vmul.f32 0.0625, %v1226_v51  ;;  %v1228_v53 = vmul.f32 %v1217_v50, %v1217_v50 }
 0x7ca   :  { %v1229_v54 = vsub.f32 %v1227_v52, %v1228_v53 }
 0x7cc   :  { %v1230_v55 = vmax.f32 %v1229_v54, 0.0 }
 0x7ce   :  { %v1231_v56 = vadd.f32 1e-05, %v1230_v55 }
 0x7d0   :  { %2434 = vrsqrt.f32 %v1231_v56  ;;  %v1283_v56 = vld [vmem:[#allocation7 + $0x8] sm:$0x1] }
 0x7dd   :  { %v2435_v58 = vpop.eup %2434 }
 0x7de   :  { %v1233_v59 = vmul.f32 %v2435_v58, %v1133_v57 }
 0x7e0   :  { %v1234_v61 = vmul.f32 %v1233_v59, %v1217_v50  ;;  %v1239_v62 = vrot.slane %v1233_v59, %v2569_v1  ;;  %v1284_v59 = vld [vmem:[#allocation7 + $0x18] sm:$0x1] }
 0x7e2   :  { %v1235_v63 = vsub.f32 %v1134_v60, %v1234_v61  ;;  %v1240_v0 = vmul.f32 %v1239_v62, %v1201_v34  ;;  %v1241_v2 = vmul.f32 %v2341_v33, %v1239_v62 }
 0x7e4   :  { %v1245_v3 = vrot.slane %v1235_v63, %v2569_v1 }
 0x7e6   :  { %v1246_v4 = vadd.f32 %v1245_v3, %v1240_v0  ;;  %v1247_v5 = vadd.f32 %v1245_v3, %v1241_v2 }
 0x7e8   :  { %v1248_v6 = vmax.f32 %v1246_v4, 0.0  ;;  %v1249_v7 = vmax.f32 %v1247_v5, 0.0 }
 0x7ea   :  { %2374 = vmatprep.mubr.f32.mxu0 %v1248_v6 }
 0x7eb   :  { %2375 = vmatmul.mubr.f32.vlgmr.msra.gmra.mxu0 %v1249_v7  ;;  %v1535_v7 = vld [vmem:[#allocation7 + $0x19] ss:$0 sm:$0xff] }
 0x8ab   :  { %v2376_v32 = vpop.f32.mrf.mxu0 }
 0x8ac   :  { %v1369_v34 = vmul.f32 %v2376_v32, %v2376_v32 }
 0x8ad   :  { %v1351_v33 = vpop.f32.mrf.mxu0 }
 0x8ae   :  { %v1360_v35 = vadd.f32 %v2376_v32, %v1351_v33  ;;  %v1368_v36 = vmul.f32 %v1351_v33, %v1351_v33 }
 0x8b0   :  { %v1361_v37 = vrot.slane %v1360_v35, 4  ;;  %v1370_v38 = vadd.f32 %v1369_v34, %v1368_v36 }
 0x8b2   :  { %v1362_v39 = vadd.f32 %v1361_v37, %v1360_v35  ;;  %v1371_v40 = vrot.slane %v1370_v38, 4 }
 0x8b4   :  { %v1363_v41 = vrot.slane %v1362_v39, 2  ;;  %v1372_v42 = vadd.f32 %v1371_v40, %v1370_v38 }
 0x8b6   :  { %v1364_v43 = vadd.f32 %v1363_v41, %v1362_v39  ;;  %v1373_v44 = vrot.slane %v1372_v42, 2 }
 0x8b8   :  { %v1365_v45 = vrot.slane %v1364_v43, 1  ;;  %v1374_v46 = vadd.f32 %v1373_v44, %v1372_v42 }
 0x8ba   :  { %v1366_v47 = vadd.f32 %v1365_v45, %v1364_v43  ;;  %v1375_v48 = vrot.slane %v1374_v46, 1 }
 0x8bc   :  { %v1367_v49 = vmul.f32 0.0625, %v1366_v47  ;;  %v1376_v50 = vadd.f32 %v1375_v48, %v1374_v46 }
 0x8be   :  { %v1377_v51 = vmul.f32 0.0625, %v1376_v50  ;;  %v1378_v52 = vmul.f32 %v1367_v49, %v1367_v49 }
 0x8c0   :  { %v1379_v53 = vsub.f32 %v1377_v51, %v1378_v52 }
 0x8c2   :  { %v1380_v54 = vmax.f32 %v1379_v53, 0.0 }
 0x8c4   :  { %v1381_v55 = vadd.f32 1e-05, %v1380_v54 }
 0x8c6   :  { %2436 = vrsqrt.f32 %v1381_v55 }
 0x8d3   :  { %v2437_v57 = vpop.eup %2436 }
 0x8d4   :  { %v1383_v58 = vmul.f32 %v2437_v57, %v1283_v56 }
 0x8d6   :  { %v1384_v60 = vmul.f32 %v1383_v58, %v1367_v49  ;;  %v1389_v61 = vrot.slane %v1383_v58, %v2569_v1 }
 0x8d8   :  { %v1385_v62 = vsub.f32 %v1284_v59, %v1384_v60  ;;  %v1390_v63 = vmul.f32 %v1389_v61, %v1351_v33  ;;  %v1391_v0 = vmul.f32 %v2376_v32, %v1389_v61 }
 0x8da   :  { %v1395_v2 = vrot.slane %v1385_v62, %v2569_v1 }
 0x8dc   :  { %v1396_v3 = vadd.f32 %v1395_v2, %v1390_v63  ;;  %v1397_v4 = vadd.f32 %v1395_v2, %v1391_v0 }
 0x8de   :  { %v1398_v5 = vmax.f32 %v1396_v3, 0.0  ;;  %v1399_v6 = vmax.f32 %v1397_v4, 0.0 }
 0x8e0   :  { %2409 = vmatprep.mubr.f32.mxu1 %v1398_v5 }
 0x8e1   :  { %2410 = vmatmul.mubr.f32.vlgmr.msra.gmra.mxu1 %v1399_v6 }
 0x9a1   :  { %v2411_v8 = vpop.f32.mrf.mxu1 }
 0x9a2   :  { %v1510_v9 = vadd.f32 %v2411_v8, %v1535_v7 }
 0x9a3   :  { %v1504_v10 = vpop.f32.mrf.mxu1 }
 0x9a4   :  { %1514 = vst.msk [vmem:[#allocation8 + $0x8] sm:$0xff] %vm77_vm0, %v1510_v9  ;;  %v1505_v11 = vadd.f32 %v1535_v7, %v1504_v10 }
 0x9a6   :  { %1513 = vst.msk [vmem:[#allocation8] sm:$0xff] %vm77_vm0, %v1505_v11 }
 0x9a7   :  { %2509 = shalt.err (!%p2506_p5)
}
 0x9a8   :  { %1526 = dma.vmem_to_hbm [thread:$0]  %s1521_s2, 256, %s2600_s3, [#allocation4], %s2528_s22, %s2528_s22, %s2529_s23  }
 0x9a9   :  { %2522 = dma.done.wait [#allocation4], 256  }
 0x9aa   :  { %2523 = vsyncadd [#allocation4], 4294967040 }
 0x9ab   :  { %1530 = vsyncpa [#allocation3], 1 }
 0x9ac   :  { %1531 = vsyncpa [#allocation6], 1 }
 0x9ad   :  { %1532 = vsyncpa [#allocation4], 1 }

</bundles_post_ra>
